<compile_context>
chip_gen: v6e
topology: v6e:2x2x1
jax: 0.10.0
libtpu: 0.0.40
codegen_flags: <defaults>
</compile_context>

<pallas_src>
import functools

import jax
import jax.numpy as jnp
from jax.experimental import pallas as pl
from jax.experimental.pallas import tpu as pltpu


# -----------------------------------------------------------------------------
# Pallas kernel: SoftArgmaxLayer with online softmax over voxel chunks.
#   torch:  x -> reshape(B, C, N, 1) -> softmax(beta*x, dim=2)
#           -> * grids(1, N, 3) -> sum(dim=2)  => (B, C, 3)
# -----------------------------------------------------------------------------
def _soft_argmax_kernel(x_ref, g_ref, out_ref, m_sc, l_sc, acc_sc, *, beta):
    # x_ref:   (row_block, chunk)  bf16/f32 scores (voxel axis lane-dense)
    # g_ref:   (3, chunk)          f32 coordinates (lane-dense per axis)
    # out_ref: (row_block, 3)      f32
    # m_sc/l_sc: (row_block, 1) f32 running max / denom; acc_sc: (row_block, 3).
    k = pl.program_id(1)

    @pl.when(k == 0)
    def _init():
        m_sc[...] = jnp.full_like(m_sc, -jnp.inf)
        l_sc[...] = jnp.zeros_like(l_sc)
        acc_sc[...] = jnp.zeros_like(acc_sc)

    # All softmax math in f32 (input may be bf16 in HBM).
    s = beta * x_ref[...].astype(jnp.float32)                       # (rb, chunk)
    m_prev = m_sc[...]                                              # (rb, 1)
    m_new = jnp.maximum(m_prev, jnp.max(s, axis=-1, keepdims=True))  # XLU reduce
    alpha = jnp.exp(m_prev - m_new)                                 # (rb, 1)
    p = jnp.exp(s - m_new)                                          # EUP, (rb, chunk)

    g = g_ref[...].astype(jnp.float32)                              # (3, chunk)
    # VPU multiply + XLU lane-reduce instead of a 3-wide MXU matmul.
    wx = jnp.sum(p * g[0:1, :], axis=-1, keepdims=True)             # (rb, 1)
    wy = jnp.sum(p * g[1:2, :], axis=-1, keepdims=True)
    wz = jnp.sum(p * g[2:3, :], axis=-1, keepdims=True)
    # Assemble (rb, 3) contribution with pure broadcast+select (no concat).
    lane = jax.lax.broadcasted_iota(jnp.int32, acc_sc.shape, 1)
    contrib = jnp.where(lane == 0, wx, jnp.where(lane == 1, wy, wz))

    l_sc[...] = alpha * l_sc[...] + jnp.sum(p, axis=-1, keepdims=True)
    acc_sc[...] = alpha * acc_sc[...] + contrib
    m_sc[...] = m_new

    @pl.when(k == pl.num_programs(1) - 1)
    def _fin():
        out_ref[...] = acc_sc[...] * pl.reciprocal(l_sc[...], approx=True)


def _round_up(v, m):
    return ((v + m - 1) // m) * m


def _pick_chunk(n, target):
    """Largest multiple-of-128 divisor of n that is <= target (fallback: n)."""
    if n <= target:
        return n
    c = (target // 128) * 128
    while c >= 128:
        if n % c == 0:
            return c
        c -= 128
    return n  # non-factorable N: single block along the voxel axis


def soft_argmax_pallas(x, grids, beta, *, x_dtype=jnp.bfloat16, chunk_target=16384):
    """x: (Bsel, C, cx, cy, cz); grids: (N, 3) float32 -> (Bsel, C, 3) float32."""
    bsel, c = x.shape[0], x.shape[1]
    n = x.shape[2] * x.shape[3] * x.shape[4]
    assert grids.shape == (n, 3)

    rows = bsel * c
    sub = 16 if x_dtype == jnp.bfloat16 else 8

    # Row (joint) blocking: one block for small row counts; two blocks so the
    # leading "parallel" axis can shard across v7x's two TensorCores otherwise.
    rows_pad = _round_up(rows, sub)
    nrb = 1 if rows_pad <= 64 else 2
    row_block = _round_up(pl.cdiv(rows_pad, nrb), sub)
    rows_pad = row_block * nrb

    # Voxel chunking: sized for v7x's 64 MiB VMEM with double buffering
    # (2 * row_block * chunk * 2B for bf16 x plus 2 * 8 * chunk * 4B for grids
    #  stays a few MiB, well under the explicit 32 MiB limit below).
    chunk = _pick_chunk(n, chunk_target)
    n_chunks = n // chunk

    # Stage x to HBM at reduced precision; padded rows are zeros (discarded).
    x2 = x.reshape(rows, n).astype(x_dtype)
    if rows_pad != rows:
        x2 = jnp.pad(x2, ((0, rows_pad - rows), (0, 0)))
    grids_t = grids.astype(jnp.float32).T            # (3, N), lane-dense

    out = pl.pallas_call(
        functools.partial(_soft_argmax_kernel, beta=float(beta)),
        out_shape=jax.ShapeDtypeStruct((rows_pad, 3), jnp.float32),
        grid_spec=pltpu.PrefetchScalarGridSpec(
            num_scalar_prefetch=0,
            grid=(nrb, n_chunks),
            in_specs=[
                pl.BlockSpec((row_block, chunk), lambda i, k: (i, k)),
                pl.BlockSpec((3, chunk), lambda i, k: (0, k)),
            ],
            out_specs=pl.BlockSpec((row_block, 3), lambda i, k: (i, 0)),
            scratch_shapes=[
                pltpu.VMEM((row_block, 1), jnp.float32),   # running max  m
                pltpu.VMEM((row_block, 1), jnp.float32),   # running sum  l
                pltpu.VMEM((row_block, 3), jnp.float32),   # weighted-coord acc
            ],
        ),
        compiler_params=pltpu.CompilerParams(
            dimension_semantics=("parallel", "arbitrary"),
            vmem_limit_bytes=32 * 1024 * 1024,
        ),
    )(x2, grids_t)
    return out[:rows].reshape(bsel, c, 3)


# -----------------------------------------------------------------------------
# Glue (plain JAX): grid-coordinate construction and forward orchestration.
# -----------------------------------------------------------------------------
def compute_grid(grid_size, grid_center, cube_size):
    """Voxel-center world coordinates, flattened row-major -> (N, 3)."""
    gx = jnp.linspace(-grid_size[0] / 2.0, grid_size[0] / 2.0, cube_size[0]) + grid_center[0]
    gy = jnp.linspace(-grid_size[1] / 2.0, grid_size[1] / 2.0, cube_size[1]) + grid_center[1]
    gz = jnp.linspace(-grid_size[2] / 2.0, grid_size[2] / 2.0, cube_size[2]) + grid_center[2]
    xx, yy, zz = jnp.meshgrid(gx, gy, gz, indexing="ij")
    return jnp.stack([xx.reshape(-1), yy.reshape(-1), zz.reshape(-1)], axis=-1)


def joint_refine_net_forward(cubes, grid_centers, *, grid_size, cube_size, beta):
    """Mirror of JointRefineNet.forward.

    cubes:        (B, J, cx, cy, cz) float32 -- per-joint 3D score volumes
                  (output of ProjectLayerJrn, taken as input here).
    grid_centers: (B, 3) float32
    returns pred: (B, J, 3) float32
    """
    batch_size, num_joints = cubes.shape[0], cubes.shape[1]
    pred = jnp.zeros((batch_size, num_joints, 3), jnp.float32)

    # TODO(synk): ProjectLayerJrn (multi-view 2D heatmap -> 3D cube projection) source
    # not provided; cubes are passed in precomputed, only its grid construction is done.
    grids = compute_grid(grid_size, grid_centers[0], cube_size)  # (N, 3)

    # index = torch.ones(1, dtype=torch.bool)  -> selects batch element 0 only
    # TODO(synk): V2VNet (3D conv encoder/decoder) source not provided; identity pass-through.
    valid_cubes = cubes[0:1]

    refined = soft_argmax_pallas(valid_cubes, grids, beta)       # (1, J, 3)
    pred = pred.at[0:1].set(refined)
    return pred


# -----------------------------------------------------------------------------
# Pure-JAX reference of the SoftArgmaxLayer semantics (for a sanity check).
# -----------------------------------------------------------------------------
def _soft_argmax_ref(x, grids, beta):
    b, c = x.shape[0], x.shape[1]
    xf = x.reshape(b, c, -1, 1).astype(jnp.float32)
    p = jax.nn.softmax(beta * xf, axis=2)            # (b, c, N, 1)
    g = grids[None]                                  # (1, N, 3)
    return jnp.sum(p * g[:, None], axis=2)           # (b, c, 3)


if __name__ == "__main__":
    key = jax.random.PRNGKey(0)
    k1, k2 = jax.random.split(key)

    # Small test shapes (module defaults are cube_size=[64]*3, grid_size=[300]*3).
    B, J = 2, 8                      # NUM_JOINTS_WHOLEBODY (small test value)
    cube_size = (16, 16, 16)         # N = 4096 voxels
    grid_size = (300.0, 300.0, 300.0)
    beta = 100.0                     # cfg.NETWORK.BETA

    cubes = jax.random.uniform(k1, (B, J) + cube_size, jnp.float32)
    grid_centers = jax.random.uniform(k2, (B, 3), jnp.float32) * 100.0

    pred = joint_refine_net_forward(
        cubes, grid_centers, grid_size=grid_size, cube_size=cube_size, beta=beta
    )
    pred = jax.block_until_ready(pred)
    assert pred.shape == (B, J, 3)

    # Validate the Pallas soft-argmax against a pure-JAX reference computed on
    # the same bf16-rounded scores (the kernel stages x to HBM as bf16; all
    # softmax math is f32 in-kernel).  Tolerance covers the approx reciprocal.
    grids = compute_grid(grid_size, grid_centers[0], cube_size)
    cubes_rounded = cubes[0:1].astype(jnp.bfloat16).astype(jnp.float32)
    ref = _soft_argmax_ref(cubes_rounded, grids, beta)
    got = pred[0:1]
    assert jnp.allclose(got, ref, rtol=5e-3, atol=5e-2), (got, ref)
    # Non-selected batch entries stay zero, as in the torch module.
    assert jnp.all(pred[1:] == 0.0)

    print("KERNEL_OK")
</pallas_src>

<mosaic_0001>
module attributes {stable_mosaic.version = 11 : i64} {
  func.func @_soft_argmax_kernel(%arg0: i32, %arg1: i32, %arg2: memref<16x4096xbf16, #tpu.memory_space<vmem>>, %arg3: memref<3x4096xf32, #tpu.memory_space<vmem>>, %arg4: memref<16x3xf32, #tpu.memory_space<vmem>>, %arg5: memref<16x1xf32, #tpu.memory_space<vmem>>, %arg6: memref<16x1xf32, #tpu.memory_space<vmem>>, %arg7: memref<16x3xf32, #tpu.memory_space<vmem>>) attributes {dimension_semantics = [#tpu.dimension_semantics<parallel>, #tpu.dimension_semantics<arbitrary>], iteration_bounds = array<i64: 1, 1>, scalar_prefetch = 0 : i64, scratch_operands = 3 : i64, tpu.core_type = #tpu.core_type<tc>, window_params = [{transform_indices = @transform_0, window_bounds = array<i64: 16, 4096>}, {transform_indices = @transform_1, window_bounds = array<i64: 3, 4096>}, {transform_indices = @transform_2, window_bounds = array<i64: 16, 3>}]} {
    %c0_i32 = arith.constant 0 : i32
    %0 = arith.cmpi eq, %arg1, %c0_i32 : i32
    %1 = arith.extui %0 : i1 to i32
    %c0_i32_0 = arith.constant 0 : i32
    %2 = arith.cmpi ne, %1, %c0_i32_0 : i32
    scf.if %2 {
      %cst_24 = arith.constant 0xFF800000 : f32
      %60 = vector.broadcast %cst_24 : f32 to vector<16x1xf32>
      %c0_25 = arith.constant 0 : index
      %c0_26 = arith.constant 0 : index
      %61 = vector.load %arg5[%c0_25, %c0_26] : memref<16x1xf32, #tpu.memory_space<vmem>>, vector<16x1xf32>
      tpu.vector_store %arg5[%c0_25, %c0_26], %60 {strides = array<i32>} : memref<16x1xf32, #tpu.memory_space<vmem>>, vector<16x1xf32>,
      %cst_27 = arith.constant 0.000000e+00 : f32
      %62 = vector.broadcast %cst_27 : f32 to vector<16x1xf32>
      %c0_28 = arith.constant 0 : index
      %c0_29 = arith.constant 0 : index
      %63 = vector.load %arg6[%c0_28, %c0_29] : memref<16x1xf32, #tpu.memory_space<vmem>>, vector<16x1xf32>
      tpu.vector_store %arg6[%c0_28, %c0_29], %62 {strides = array<i32>} : memref<16x1xf32, #tpu.memory_space<vmem>>, vector<16x1xf32>,
      %cst_30 = arith.constant 0.000000e+00 : f32
      %64 = vector.broadcast %cst_30 : f32 to vector<16x3xf32>
      %c0_31 = arith.constant 0 : index
      %c0_32 = arith.constant 0 : index
      %65 = vector.load %arg7[%c0_31, %c0_32] : memref<16x3xf32, #tpu.memory_space<vmem>>, vector<16x3xf32>
      tpu.vector_store %arg7[%c0_31, %c0_32], %64 {strides = array<i32>} : memref<16x3xf32, #tpu.memory_space<vmem>>, vector<16x3xf32>,
    } else {
    }
    %c0 = arith.constant 0 : index
    %c0_1 = arith.constant 0 : index
    %3 = vector.load %arg2[%c0, %c0_1] : memref<16x4096xbf16, #tpu.memory_space<vmem>>, vector<16x4096xbf16>
    %4 = arith.extf %3 : vector<16x4096xbf16> to vector<16x4096xf32>
    %cst = arith.constant 1.000000e+02 : f32
    %5 = vector.broadcast %cst : f32 to vector<16x4096xf32>
    %6 = arith.mulf %5, %4 : vector<16x4096xf32>
    %c0_2 = arith.constant 0 : index
    %c0_3 = arith.constant 0 : index
    %7 = vector.load %arg5[%c0_2, %c0_3] : memref<16x1xf32, #tpu.memory_space<vmem>>, vector<16x1xf32>
    %cst_4 = arith.constant dense<0xFF800000> : vector<16xf32>
    %8 = vector.multi_reduction <maximumf>, %6, %cst_4 [1] : vector<16x4096xf32> to vector<16xf32>
    %9 = vector.shape_cast %8 : vector<16xf32> to vector<16x1xf32>
    %10 = arith.maximumf %7, %9 : vector<16x1xf32>
    %11 = arith.subf %7, %10 : vector<16x1xf32>
    %12 = math.exp %11 : vector<16x1xf32>
    %13 = vector.broadcast %10 : vector<16x1xf32> to vector<16x4096xf32>
    %14 = arith.subf %6, %13 : vector<16x4096xf32>
    %15 = math.exp %14 : vector<16x4096xf32>
    %c0_5 = arith.constant 0 : index
    %c0_6 = arith.constant 0 : index
    %16 = vector.load %arg3[%c0_5, %c0_6] : memref<3x4096xf32, #tpu.memory_space<vmem>>, vector<3x4096xf32>
    %17 = vector.extract_strided_slice %16 {offsets = [0, 0], sizes = [1, 4096], strides = [1, 1]} : vector<3x4096xf32> to vector<1x4096xf32>
    %18 = vector.broadcast %17 : vector<1x4096xf32> to vector<16x4096xf32>
    %19 = arith.mulf %15, %18 : vector<16x4096xf32>
    %cst_7 = arith.constant dense<0.000000e+00> : vector<16xf32>
    %20 = vector.multi_reduction <add>, %19, %cst_7 [1] : vector<16x4096xf32> to vector<16xf32>
    %21 = vector.shape_cast %20 : vector<16xf32> to vector<16x1xf32>
    %22 = vector.extract_strided_slice %16 {offsets = [1, 0], sizes = [1, 4096], strides = [1, 1]} : vector<3x4096xf32> to vector<1x4096xf32>
    %23 = vector.broadcast %22 : vector<1x4096xf32> to vector<16x4096xf32>
    %24 = arith.mulf %15, %23 : vector<16x4096xf32>
    %cst_8 = arith.constant dense<0.000000e+00> : vector<16xf32>
    %25 = vector.multi_reduction <add>, %24, %cst_8 [1] : vector<16x4096xf32> to vector<16xf32>
    %26 = vector.shape_cast %25 : vector<16xf32> to vector<16x1xf32>
    %27 = vector.extract_strided_slice %16 {offsets = [2, 0], sizes = [1, 4096], strides = [1, 1]} : vector<3x4096xf32> to vector<1x4096xf32>
    %28 = vector.broadcast %27 : vector<1x4096xf32> to vector<16x4096xf32>
    %29 = arith.mulf %15, %28 : vector<16x4096xf32>
    %cst_9 = arith.constant dense<0.000000e+00> : vector<16xf32>
    %30 = vector.multi_reduction <add>, %29, %cst_9 [1] : vector<16x4096xf32> to vector<16xf32>
    %31 = vector.shape_cast %30 : vector<16xf32> to vector<16x1xf32>
    %32 = tpu.iota {dimensions = array<i32: 1>} : vector<16x3xi32>
    %c0_i32_10 = arith.constant 0 : i32
    %33 = vector.broadcast %c0_i32_10 : i32 to vector<16x3xi32>
    %34 = arith.cmpi eq, %32, %33 : vector<16x3xi32>
    %c1_i32 = arith.constant 1 : i32
    %35 = vector.broadcast %c1_i32 : i32 to vector<16x3xi32>
    %36 = arith.cmpi eq, %32, %35 : vector<16x3xi32>
    %37 = vector.shape_cast %26 : vector<16x1xf32> to vector<16x1xf32>
    %38 = vector.broadcast %37 : vector<16x1xf32> to vector<16x3xf32>
    %39 = vector.shape_cast %31 : vector<16x1xf32> to vector<16x1xf32>
    %40 = vector.broadcast %39 : vector<16x1xf32> to vector<16x3xf32>
    %41 = arith.select %36, %38, %40 : vector<16x3xi1>, vector<16x3xf32>
    %42 = vector.shape_cast %21 : vector<16x1xf32> to vector<16x1xf32>
    %43 = vector.broadcast %42 : vector<16x1xf32> to vector<16x3xf32>
    %44 = arith.select %34, %43, %41 : vector<16x3xi1>, vector<16x3xf32>
    %c0_11 = arith.constant 0 : index
    %c0_12 = arith.constant 0 : index
    %45 = vector.load %arg6[%c0_11, %c0_12] : memref<16x1xf32, #tpu.memory_space<vmem>>, vector<16x1xf32>
    %46 = arith.mulf %12, %45 : vector<16x1xf32>
    %cst_13 = arith.constant dense<0.000000e+00> : vector<16xf32>
    %47 = vector.multi_reduction <add>, %15, %cst_13 [1] : vector<16x4096xf32> to vector<16xf32>
    %48 = vector.shape_cast %47 : vector<16xf32> to vector<16x1xf32>
    %49 = arith.addf %46, %48 : vector<16x1xf32>
    %c0_14 = arith.constant 0 : index
    %c0_15 = arith.constant 0 : index
    %50 = vector.load %arg6[%c0_14, %c0_15] : memref<16x1xf32, #tpu.memory_space<vmem>>, vector<16x1xf32>
    tpu.vector_store %arg6[%c0_14, %c0_15], %49 {strides = array<i32>} : memref<16x1xf32, #tpu.memory_space<vmem>>, vector<16x1xf32>,
    %c0_16 = arith.constant 0 : index
    %c0_17 = arith.constant 0 : index
    %51 = vector.load %arg7[%c0_16, %c0_17] : memref<16x3xf32, #tpu.memory_space<vmem>>, vector<16x3xf32>
    %52 = vector.broadcast %12 : vector<16x1xf32> to vector<16x3xf32>
    %53 = arith.mulf %52, %51 : vector<16x3xf32>
    %54 = arith.addf %53, %44 : vector<16x3xf32>
    %c0_18 = arith.constant 0 : index
    %c0_19 = arith.constant 0 : index
    %55 = vector.load %arg7[%c0_18, %c0_19] : memref<16x3xf32, #tpu.memory_space<vmem>>, vector<16x3xf32>
    tpu.vector_store %arg7[%c0_18, %c0_19], %54 {strides = array<i32>} : memref<16x3xf32, #tpu.memory_space<vmem>>, vector<16x3xf32>,
    %c0_20 = arith.constant 0 : index
    %c0_21 = arith.constant 0 : index
    %56 = vector.load %arg5[%c0_20, %c0_21] : memref<16x1xf32, #tpu.memory_space<vmem>>, vector<16x1xf32>
    tpu.vector_store %arg5[%c0_20, %c0_21], %10 {strides = array<i32>} : memref<16x1xf32, #tpu.memory_space<vmem>>, vector<16x1xf32>,
    %c0_i32_22 = arith.constant 0 : i32
    %57 = arith.cmpi eq, %arg1, %c0_i32_22 : i32
    %58 = arith.extui %57 : i1 to i32
    %c0_i32_23 = arith.constant 0 : i32
    %59 = arith.cmpi ne, %58, %c0_i32_23 : i32
    scf.if %59 {
      %c0_24 = arith.constant 0 : index
      %c0_25 = arith.constant 0 : index
      %60 = vector.load %arg7[%c0_24, %c0_25] : memref<16x3xf32, #tpu.memory_space<vmem>>, vector<16x3xf32>
      %c0_26 = arith.constant 0 : index
      %c0_27 = arith.constant 0 : index
      %61 = vector.load %arg6[%c0_26, %c0_27] : memref<16x1xf32, #tpu.memory_space<vmem>>, vector<16x1xf32>
      %62 = tpu.reciprocal %61 {approx = true} : vector<16x1xf32> -> vector<16x1xf32>
      %63 = vector.broadcast %62 : vector<16x1xf32> to vector<16x3xf32>
      %64 = arith.mulf %60, %63 : vector<16x3xf32>
      %c0_28 = arith.constant 0 : index
      %c0_29 = arith.constant 0 : index
      %65 = vector.load %arg4[%c0_28, %c0_29] : memref<16x3xf32, #tpu.memory_space<vmem>>, vector<16x3xf32>
      tpu.vector_store %arg4[%c0_28, %c0_29], %64 {strides = array<i32>} : memref<16x3xf32, #tpu.memory_space<vmem>>, vector<16x3xf32>,
    } else {
    }
    return
  }
  func.func @transform_0(%arg0: i32, %arg1: i32) -> (i32, i32) {
    %c0_i32 = arith.constant 0 : i32
    return %arg0, %arg1 : i32, i32
  }
  func.func @transform_1(%arg0: i32, %arg1: i32) -> (i32, i32) {
    %c0_i32 = arith.constant 0 : i32
    %c0_i32_0 = arith.constant 0 : i32
    return %c0_i32, %arg1 : i32, i32
  }
  func.func @transform_2(%arg0: i32, %arg1: i32) -> (i32, i32) {
    %c0_i32 = arith.constant 0 : i32
    %c0_i32_0 = arith.constant 0 : i32
    return %arg0, %c0_i32 : i32, i32
  }
}

</mosaic_0001>

<bundles_post_ra>
// kernel: tpu_custom_call.1
= control target key start
LH: loop header
LB: loop body
LE: loop exit
PB: predicated region body
PF: predicated region fallthrough
CT: control target
= control target key end

     0   :  { %7 = vsyncpa [#allocation6], 0  ;;  %s3918_s0 = inlined_call_operand.hbm [shape: bf16[16,4096], index: 0, kind: input, shape index: {}]   ;;  %s3919_s1 = inlined_call_operand.hbm [shape: f32[3,4096], index: 1, kind: input, shape index: {}]   ;;  %s3920_s2 = inlined_call_operand.vmem [shape: f32[16,3], index: 2, kind: output, shape index: {}]  }
   0x1   :  { %8 = vsyncpa [#allocation8], 0  ;;  %s2095_s9 = smov [#allocation5]  }
   0x2   :  { %s14_s10 = sshll.u32 %s2095_s9, 4  ;;  %s15_s10 = int_to_ptr.vmem [resolvable:$true] %s14_s10 }
   0x3   :  { %s2059_s11 = scalar_lea.vmem %s15_s10, 4096  ;;  %p2064_p1 = scmp.lt.s32.totalorder %s15_s10, %s15_s10 }
   0x4   :  { %p2060_p0 = scmp.ne.s32.totalorder %s15_s10, %s2059_s11  ;;  %p2065_p2 = scmp.lt.s32.totalorder %s2059_s11, %s2059_s11 }
   0x6   :  { %p2066_p3 = por %p2065_p2, %p2064_p1 }
   0x8   :  { %p2067_p4 = pnand %p2066_p3, %p2060_p0 }
   0xa   :  { %2070 = shalt.err (!%p2067_p4)
}
   0xb   :  { %s2096_s12 = smov 2048   ;;  %s2097_s13 = smov 128  }
   0xc   :  { %20 = dma.hbm_to_vmem [thread:$0]  %s3918_s0, 4096, %s15_s10, [#allocation6], %s2096_s12, %s2096_s12, %s2097_s13  }
   0xd   :  { %s2098_s16 = smov [#allocation7]  }
   0xe   :  { %s27_s17 = sshll.u32 %s2098_s16, 4  ;;  %s28_s17 = int_to_ptr.vmem [resolvable:$true] %s27_s17 }
   0xf   :  { %s2079_s18 = scalar_lea.vmem %s28_s17, 2048  ;;  %p2084_p6 = scmp.lt.s32.totalorder %s28_s17, %s28_s17 }
  0x10   :  { %p2080_p5 = scmp.ne.s32.totalorder %s28_s17, %s2079_s18  ;;  %p2085_p7 = scmp.lt.s32.totalorder %s2079_s18, %s2079_s18 }
  0x12   :  { %p2086_p8 = por %p2085_p7, %p2084_p6 }
  0x14   :  { %p2087_p9 = pnand %p2086_p8, %p2080_p5 }
  0x16   :  { %2090 = shalt.err (!%p2087_p9)
}
  0x17   :  { %30 = dma.hbm_to_vmem [thread:$0]  %s3919_s1, 2048, %s28_s17, [#allocation8]  }
  0x18   :  { %2091 = dma.done.wait [#allocation6], 4096  }
  0x19   :  { %2092 = vsyncadd [#allocation6], 4294963200 }
  0x1a   :  { %2093 = dma.done.wait [#allocation8], 2048  }
  0x1b   :  { %2094 = vsyncadd [#allocation8], 4294965248  ;;  %vm41_vm0 = vcmask 7168   ;;  %v2099_v0 = vmov -inf   ;;  %v49_v1 = vld [vmem:[#allocation5] sm:$0xff]  ;;  %v50_v2 = vld [vmem:[#allocation5 + $0x8] sm:$0xff] }
  0x1c   :  { %42 = vst.msk [vmem:[#allocation2] sm:$0xff] %vm41_vm0, %v2099_v0  ;;  %43 = vst.msk [vmem:[#allocation2 + $0x8] sm:$0xff] %vm41_vm0, %v2099_v0  ;;  %v51_v3 = vld [vmem:[#allocation5 + $0x10] sm:$0xff]  ;;  %v52_v4 = vld [vmem:[#allocation5 + $0x18] sm:$0xff]  ;;  %v81_v5 = vunpack.c.l.bf16 %v49_v1  ;;  %v82_v6 = vunpack.c.h.bf16 %v49_v1  ;;  %v83_v7 = vunpack.c.l.bf16 %v50_v2  ;;  %v84_v8 = vunpack.c.h.bf16 %v50_v2 }
  0x1d   :  { %v85_v9 = vunpack.c.l.bf16 %v51_v3  ;;  %v86_v10 = vunpack.c.h.bf16 %v51_v3  ;;  %v53_v11 = vld [vmem:[#allocation5 + $0x20] sm:$0xff]  ;;  %v87_v12 = vunpack.c.l.bf16 %v52_v4  ;;  %v88_v13 = vunpack.c.h.bf16 %v52_v4  ;;  %v54_v14 = vld [vmem:[#allocation5 + $0x28] sm:$0xff]  ;;  %v55_v15 = vld [vmem:[#allocation5 + $0x30] sm:$0xff] }
  0x1e   :  { %v2125_v16 = vmul.f32 100.0, %v81_v5  ;;  %v2127_v17 = vmul.f32 100.0, %v82_v6  ;;  %v2129_v18 = vmul.f32 100.0, %v83_v7  ;;  %v2131_v19 = vmul.f32 100.0, %v84_v8  ;;  %v56_v20 = vld [vmem:[#allocation5 + $0x38] sm:$0xff]  ;;  %v57_v21 = vld [vmem:[#allocation5 + $0x40] sm:$0xff] }
  0x1f   :  { %v89_v22 = vunpack.c.l.bf16 %v53_v11  ;;  %v90_v23 = vunpack.c.h.bf16 %v53_v11  ;;  %v2133_v24 = vmul.f32 100.0, %v85_v9  ;;  %v2135_v25 = vmul.f32 100.0, %v86_v10  ;;  %v58_v30 = vld [vmem:[#allocation5 + $0x48] sm:$0xff]  ;;  %v59_v31 = vld [vmem:[#allocation5 + $0x50] sm:$0xff]  ;;  %v60_v40 = vld [vmem:[#allocation5 + $0x58] sm:$0xff] }
  0x20   :  { %v91_v26 = vunpack.c.l.bf16 %v54_v14  ;;  %v92_v27 = vunpack.c.h.bf16 %v54_v14  ;;  %v93_v28 = vunpack.c.l.bf16 %v55_v15  ;;  %v94_v29 = vunpack.c.h.bf16 %v55_v15  ;;  %v61_v41 = vld [vmem:[#allocation5 + $0x60] sm:$0xff]  ;;  %v62_v50 = vld [vmem:[#allocation5 + $0x68] sm:$0xff]  ;;  %v63_v51 = vld [vmem:[#allocation5 + $0x70] sm:$0xff] }
  0x21   :  { %v2137_v32 = vmul.f32 100.0, %v87_v12  ;;  %v2139_v33 = vmul.f32 100.0, %v88_v13  ;;  %v211_v34 = vmax.f32 %v2125_v16, %v2129_v18  ;;  %v212_v35 = vmax.f32 %v2127_v17, %v2131_v19  ;;  %v64_v60 = vld [vmem:[#allocation5 + $0x78] sm:$0xff] }
  0x22   :  { %v95_v36 = vunpack.c.l.bf16 %v56_v20  ;;  %v96_v37 = vunpack.c.h.bf16 %v56_v20  ;;  %v97_v38 = vunpack.c.l.bf16 %v57_v21  ;;  %v98_v39 = vunpack.c.h.bf16 %v57_v21  ;;  %v65_v21 = vld [vmem:[#allocation5 + $0x80] sm:$0xff] }
  0x23   :  { %4213 = vst [vmem:[#allocation11_spill] sm:$0xff] %v2137_v32  ;;  %4214 = vst [vmem:[#allocation12_spill] sm:$0xff] %v2139_v33  ;;  %v2145_v42 = vmul.f32 100.0, %v89_v22  ;;  %v2147_v43 = vmul.f32 100.0, %v90_v23  ;;  %v213_v44 = vmax.f32 %v211_v34, %v2133_v24  ;;  %v214_v45 = vmax.f32 %v212_v35, %v2135_v25  ;;  %v66_v22 = vld [vmem:[#allocation5 + $0x88] sm:$0xff]  ;;  %v67_v35 = vld [vmem:[#allocation5 + $0x90] sm:$0xff] }
  0x24   :  { %v99_v46 = vunpack.c.l.bf16 %v58_v30  ;;  %v100_v47 = vunpack.c.h.bf16 %v58_v30  ;;  %v101_v48 = vunpack.c.l.bf16 %v59_v31  ;;  %v102_v49 = vunpack.c.h.bf16 %v59_v31 }
  0x25   :  { %4215 = vst [vmem:[#allocation13_spill] sm:$0xff] %v2145_v42  ;;  %4216 = vst [vmem:[#allocation14_spill] sm:$0xff] %v2147_v43  ;;  %v2151_v52 = vmul.f32 100.0, %v91_v26  ;;  %v2153_v53 = vmul.f32 100.0, %v92_v27  ;;  %v215_v54 = vmax.f32 %v213_v44, %v2137_v32  ;;  %v216_v55 = vmax.f32 %v214_v45, %v2139_v33 }
  0x26   :  { %v103_v56 = vunpack.c.l.bf16 %v60_v40  ;;  %v104_v57 = vunpack.c.h.bf16 %v60_v40  ;;  %v105_v58 = vunpack.c.l.bf16 %v61_v41  ;;  %v106_v59 = vunpack.c.h.bf16 %v61_v41 }
  0x27   :  { %4217 = vst [vmem:[#allocation15_spill] sm:$0xff] %v2151_v52  ;;  %4218 = vst [vmem:[#allocation16_spill] sm:$0xff] %v2153_v53  ;;  %v2157_v61 = vmul.f32 100.0, %v93_v28  ;;  %v2159_v62 = vmul.f32 100.0, %v94_v29  ;;  %v217_v63 = vmax.f32 %v215_v54, %v2145_v42  ;;  %v218_v0 = vmax.f32 %v216_v55, %v2147_v43  ;;  %v69_v55 = vld [vmem:[#allocation5 + $0xa0] sm:$0xff] }
  0x28   :  { %v107_v1 = vunpack.c.l.bf16 %v62_v50  ;;  %v108_v2 = vunpack.c.h.bf16 %v62_v50  ;;  %v109_v3 = vunpack.c.l.bf16 %v63_v51  ;;  %v110_v4 = vunpack.c.h.bf16 %v63_v51 }
  0x29   :  { %4219 = vst [vmem:[#allocation17_spill] sm:$0xff] %v2157_v61  ;;  %4220 = vst [vmem:[#allocation18_spill] sm:$0xff] %v2159_v62  ;;  %v2163_v5 = vmul.f32 100.0, %v95_v36  ;;  %v2165_v6 = vmul.f32 100.0, %v96_v37  ;;  %v219_v7 = vmax.f32 %v217_v63, %v2151_v52  ;;  %v220_v8 = vmax.f32 %v218_v0, %v2153_v53  ;;  %v68_v36 = vld [vmem:[#allocation5 + $0x98] sm:$0xff] }
  0x2a   :  { %v111_v9 = vunpack.c.l.bf16 %v64_v60  ;;  %v112_v10 = vunpack.c.h.bf16 %v64_v60  ;;  %v2169_v11 = vmul.f32 100.0, %v97_v38  ;;  %v2171_v12 = vmul.f32 100.0, %v98_v39 }
  0x2b   :  { %4221 = vst [vmem:[#allocation19_spill] sm:$0xff] %v2163_v5  ;;  %4222 = vst [vmem:[#allocation20_spill] sm:$0xff] %v2165_v6  ;;  %v2173_v13 = vmul.f32 100.0, %v99_v46  ;;  %v2175_v14 = vmul.f32 100.0, %v100_v47  ;;  %v221_v15 = vmax.f32 %v219_v7, %v2157_v61  ;;  %v222_v20 = vmax.f32 %v220_v8, %v2159_v62  ;;  %v71_v7 = vld [vmem:[#allocation5 + $0xb0] sm:$0xff] }
  0x2c   :  { %4223 = vst [vmem:[#allocation21_spill] sm:$0xff] %v2169_v11  ;;  %4224 = vst [vmem:[#allocation22_spill] sm:$0xff] %v2171_v12  ;;  %v2179_v23 = vmul.f32 100.0, %v101_v48  ;;  %v2181_v26 = vmul.f32 100.0, %v102_v49  ;;  %v2183_v27 = vmul.f32 100.0, %v103_v56  ;;  %v2185_v28 = vmul.f32 100.0, %v104_v57 }
  0x2d   :  { %4225 = vst [vmem:[#allocation23_spill] sm:$0xff] %v2173_v13  ;;  %4226 = vst [vmem:[#allocation24_spill] sm:$0xff] %v2175_v14  ;;  %v2187_v29 = vmul.f32 100.0, %v105_v58  ;;  %v2189_v30 = vmul.f32 100.0, %v106_v59  ;;  %v223_v31 = vmax.f32 %v221_v15, %v2163_v5  ;;  %v224_v34 = vmax.f32 %v222_v20, %v2165_v6  ;;  %v70_v58 = vld [vmem:[#allocation5 + $0xa8] sm:$0xff] }
  0x2e   :  { %4227 = vst [vmem:[#allocation25_spill] sm:$0xff] %v2179_v23  ;;  %4228 = vst [vmem:[#allocation26_spill] sm:$0xff] %v2181_v26  ;;  %v113_v37 = vunpack.c.l.bf16 %v65_v21  ;;  %v114_v38 = vunpack.c.h.bf16 %v65_v21  ;;  %v115_v39 = vunpack.c.l.bf16 %v66_v22  ;;  %v116_v40 = vunpack.c.h.bf16 %v66_v22 }
  0x2f   :  { %4229 = vst [vmem:[#allocation27_spill] sm:$0xff] %v2183_v27  ;;  %4230 = vst [vmem:[#allocation28_spill] sm:$0xff] %v2185_v28  ;;  %v2193_v41 = vmul.f32 100.0, %v107_v1  ;;  %v2195_v44 = vmul.f32 100.0, %v108_v2  ;;  %v225_v45 = vmax.f32 %v223_v31, %v2169_v11  ;;  %v226_v46 = vmax.f32 %v224_v34, %v2171_v12 }
  0x30   :  { %4231 = vst [vmem:[#allocation29_spill] sm:$0xff] %v2187_v29  ;;  %4232 = vst [vmem:[#allocation30_spill] sm:$0xff] %v2189_v30  ;;  %v2199_v47 = vmul.f32 100.0, %v109_v3  ;;  %v2201_v48 = vmul.f32 100.0, %v110_v4  ;;  %v117_v49 = vunpack.c.l.bf16 %v67_v35  ;;  %v118_v50 = vunpack.c.h.bf16 %v67_v35  ;;  %v72_v35 = vld [vmem:[#allocation5 + $0xb8] sm:$0xff] }
  0x31   :  { %4233 = vst [vmem:[#allocation31_spill] sm:$0xff] %v2193_v41  ;;  %4234 = vst [vmem:[#allocation32_spill] sm:$0xff] %v2195_v44  ;;  %v227_v51 = vmax.f32 %v225_v45, %v2173_v13  ;;  %v228_v54 = vmax.f32 %v226_v46, %v2175_v14  ;;  %v119_v56 = vunpack.c.l.bf16 %v68_v36  ;;  %v120_v57 = vunpack.c.h.bf16 %v68_v36 }
  0x32   :  { %4235 = vst [vmem:[#allocation33_spill] sm:$0xff] %v2199_v47  ;;  %4236 = vst [vmem:[#allocation34_spill] sm:$0xff] %v2201_v48  ;;  %v2205_v59 = vmul.f32 100.0, %v113_v37  ;;  %v2207_v60 = vmul.f32 100.0, %v114_v38  ;;  %v2209_v63 = vmul.f32 100.0, %v115_v39  ;;  %v2211_v0 = vmul.f32 100.0, %v116_v40 }
  0x33   :  { %v2213_v1 = vmul.f32 100.0, %v111_v9  ;;  %v2215_v2 = vmul.f32 100.0, %v112_v10  ;;  %v229_v3 = vmax.f32 %v227_v51, %v2179_v23  ;;  %v230_v4 = vmax.f32 %v228_v54, %v2181_v26 }
  0x34   :  { %4237 = vst [vmem:[#allocation35_spill] sm:$0xff] %v2205_v59  ;;  %4238 = vst [vmem:[#allocation36_spill] sm:$0xff] %v2207_v60  ;;  %v121_v8 = vunpack.c.l.bf16 %v69_v55  ;;  %v122_v15 = vunpack.c.h.bf16 %v69_v55  ;;  %v2219_v20 = vmul.f32 100.0, %v117_v49  ;;  %v2221_v21 = vmul.f32 100.0, %v118_v50  ;;  %v73_v49 = vld [vmem:[#allocation5 + $0xc0] sm:$0xff] }
  0x35   :  { %4239 = vst [vmem:[#allocation37_spill] sm:$0xff] %v2209_v63  ;;  %4240 = vst [vmem:[#allocation38_spill] sm:$0xff] %v2211_v0  ;;  %v231_v22 = vmax.f32 %v229_v3, %v2183_v27  ;;  %v232_v31 = vmax.f32 %v230_v4, %v2185_v28  ;;  %v123_v34 = vunpack.c.l.bf16 %v70_v58  ;;  %v124_v9 = vunpack.c.h.bf16 %v70_v58  ;;  %v74_v4 = vld [vmem:[#allocation5 + $0xc8] sm:$0xff] }
  0x36   :  { %4241 = vst [vmem:[#allocation39_spill] sm:$0xff] %v2213_v1  ;;  %4242 = vst [vmem:[#allocation40_spill] sm:$0xff] %v2215_v2  ;;  %v2225_v10 = vmul.f32 100.0, %v119_v56  ;;  %v2227_v36 = vmul.f32 100.0, %v120_v57  ;;  %v244_v37 = vmax.f32 %v2205_v59, %v2209_v63  ;;  %v245_v38 = vmax.f32 %v2207_v60, %v2211_v0 }
  0x37   :  { %4243 = vst [vmem:[#allocation41_spill] sm:$0xff] %v2219_v20  ;;  %4244 = vst [vmem:[#allocation42_spill] sm:$0xff] %v2221_v21  ;;  %v233_v39 = vmax.f32 %v231_v22, %v2187_v29  ;;  %v234_v40 = vmax.f32 %v232_v31, %v2189_v30  ;;  %v125_v45 = vunpack.c.l.bf16 %v71_v7  ;;  %v126_v46 = vunpack.c.h.bf16 %v71_v7 }
  0x38   :  { %4245 = vst [vmem:[#allocation43_spill] sm:$0xff] %v2225_v10  ;;  %4246 = vst [vmem:[#allocation44_spill] sm:$0xff] %v2227_v36  ;;  %v2235_v50 = vmul.f32 100.0, %v121_v8  ;;  %v2237_v51 = vmul.f32 100.0, %v122_v15  ;;  %v246_v54 = vmax.f32 %v244_v37, %v2219_v20  ;;  %v247_v55 = vmax.f32 %v245_v38, %v2221_v21 }
  0x39   :  { %v235_v56 = vmax.f32 %v233_v39, %v2193_v41  ;;  %v236_v57 = vmax.f32 %v234_v40, %v2195_v44  ;;  %v127_v58 = vunpack.c.l.bf16 %v72_v35  ;;  %v128_v3 = vunpack.c.h.bf16 %v72_v35  ;;  %v75_v39 = vld [vmem:[#allocation5 + $0xd0] sm:$0xff] }
  0x3a   :  { %4247 = vst [vmem:[#allocation45_spill] sm:$0xff] %v2235_v50  ;;  %4248 = vst [vmem:[#allocation46_spill] sm:$0xff] %v2237_v51  ;;  %v2243_v22 = vmul.f32 100.0, %v123_v34  ;;  %v2245_v31 = vmul.f32 100.0, %v124_v9  ;;  %v248_v7 = vmax.f32 %v246_v54, %v2225_v10  ;;  %v249_v8 = vmax.f32 %v247_v55, %v2227_v36 }
  0x3b   :  { %v237_v15 = vmax.f32 %v235_v56, %v2199_v47  ;;  %v238_v37 = vmax.f32 %v236_v57, %v2201_v48  ;;  %v129_v38 = vunpack.c.l.bf16 %v73_v49  ;;  %v130_v21 = vunpack.c.h.bf16 %v73_v49  ;;  %v76_v56 = vld [vmem:[#allocation5 + $0xd8] sm:$0xff]  ;;  %v2413_v48 = vld [vmem:[#allocation7 + $0x70] sm:$0x77] }
  0x3c   :  { %4249 = vst [vmem:[#allocation47_spill] sm:$0xff] %v2243_v22  ;;  %4250 = vst [vmem:[#allocation48_spill] sm:$0xff] %v2245_v31  ;;  %v2251_v20 = vmul.f32 100.0, %v125_v45  ;;  %v2253_v40 = vmul.f32 100.0, %v126_v46  ;;  %v250_v34 = vmax.f32 %v248_v7, %v2235_v50  ;;  %v251_v9 = vmax.f32 %v249_v8, %v2237_v51  ;;  %v77_v50 = vld [vmem:[#allocation5 + $0xe0] sm:$0xff]  ;;  %v78_v51 = vld [vmem:[#allocation5 + $0xe8] sm:$0xff] }
  0x3d   :  { %v239_v35 = vmax.f32 %v237_v15, %v2213_v1  ;;  %v240_v54 = vmax.f32 %v238_v37, %v2215_v2  ;;  %v131_v55 = vunpack.c.l.bf16 %v74_v4  ;;  %v132_v36 = vunpack.c.h.bf16 %v74_v4  ;;  %v2415_v47 = vld [vmem:[#allocation7 + $0x78] sm:$0x77] }
  0x3e   :  { %4251 = vst [vmem:[#allocation49_spill] sm:$0xff] %v2251_v20  ;;  %4252 = vst [vmem:[#allocation50_spill] sm:$0xff] %v2253_v40  ;;  %v2259_v10 = vmul.f32 100.0, %v127_v58  ;;  %v2261_v57 = vmul.f32 100.0, %v128_v3  ;;  %v252_v45 = vmax.f32 %v250_v34, %v2243_v22  ;;  %v253_v46 = vmax.f32 %v251_v9, %v2245_v31  ;;  %v2401_v31 = vld [vmem:[#allocation7 + $0x60] sm:$0x77] }
  0x3f   :  { %v241_v49 = vmax.f32 %v239_v35, %v240_v54  ;;  %v133_v0 = vunpack.c.l.bf16 %v75_v39  ;;  %v134_v7 = vunpack.c.h.bf16 %v75_v39  ;;  %v2265_v8 = vmul.f32 100.0, %v129_v38  ;;  %v2403_v22 = vld [vmem:[#allocation7 + $0x68] sm:$0x77] }
  0x40   :  { %4253 = vst [vmem:[#allocation51_spill] sm:$0xff] %v2259_v10  ;;  %4254 = vst [vmem:[#allocation52_spill] sm:$0xff] %v2261_v57  ;;  %v2267_v15 = vmul.f32 100.0, %v130_v21  ;;  %v254_v37 = vmax.f32 %v252_v45, %v2251_v20  ;;  %v255_v4 = vmax.f32 %v253_v46, %v2253_v40  ;;  %v135_v58 = vunpack.c.l.bf16 %v76_v56  ;;  %v79_v21 = vld [vmem:[#allocation5 + $0xf0] sm:$0xff]  ;;  %v80_v40 = vld [vmem:[#allocation5 + $0xf8] sm:$0xff] }
  0x41   :  { %4255 = vst [vmem:[#allocation53_spill] sm:$0xff] %v2265_v8  ;;  %242 = vmax.xlane.f32.xlu0 %v241_v49  ;;  %v136_v3 = vunpack.c.h.bf16 %v76_v56  ;;  %v2271_v63 = vmul.f32 100.0, %v131_v55  ;;  %v2273_v34 = vmul.f32 100.0, %v132_v36  ;;  %v137_v38 = vunpack.c.l.bf16 %v77_v50 }
  0x42   :  { %4256 = vst [vmem:[#allocation54_spill] sm:$0xff] %v2267_v15  ;;  %v256_v9 = vmax.f32 %v254_v37, %v2259_v10  ;;  %v257_v39 = vmax.f32 %v255_v4, %v2261_v57  ;;  %v138_v35 = vunpack.c.h.bf16 %v77_v50  ;;  %v2277_v54 = vmul.f32 100.0, %v133_v0 }
  0x43   :  { %4257 = vst [vmem:[#allocation55_spill] sm:$0xff] %v2271_v63  ;;  %4258 = vst [vmem:[#allocation56_spill] sm:$0xff] %v2273_v34  ;;  %v2279_v45 = vmul.f32 100.0, %v134_v7  ;;  %v139_v49 = vunpack.c.l.bf16 %v78_v51  ;;  %v140_v55 = vunpack.c.h.bf16 %v78_v51  ;;  %v2283_v36 = vmul.f32 100.0, %v135_v58 }
  0x44   :  { %4259 = vst [vmem:[#allocation57_spill] sm:$0xff] %v2277_v54  ;;  %v258_v46 = vmax.f32 %v256_v9, %v2265_v8  ;;  %v259_v56 = vmax.f32 %v257_v39, %v2267_v15  ;;  %v2285_v20 = vmul.f32 100.0, %v136_v3  ;;  %v141_v4 = vunpack.c.l.bf16 %v79_v21 }
  0x45   :  { %4260 = vst [vmem:[#allocation58_spill] sm:$0xff] %v2279_v45  ;;  %4261 = vst [vmem:[#allocation59_spill] sm:$0xff] %v2283_v36  ;;  %v142_v0 = vunpack.c.h.bf16 %v79_v21  ;;  %v2289_v57 = vmul.f32 100.0, %v137_v38  ;;  %v2291_v7 = vmul.f32 100.0, %v138_v35  ;;  %v143_v51 = vunpack.c.l.bf16 %v80_v40 }
  0x46   :  { %4262 = vst [vmem:[#allocation60_spill] sm:$0xff] %v2285_v20  ;;  %v260_v37 = vmax.f32 %v258_v46, %v2271_v63  ;;  %v261_v50 = vmax.f32 %v259_v56, %v2273_v34  ;;  %v144_v15 = vunpack.c.h.bf16 %v80_v40  ;;  %v2295_v58 = vmul.f32 100.0, %v139_v49 }
  0x47   :  { %4263 = vst [vmem:[#allocation61_spill] sm:$0xff] %v2289_v57  ;;  %4264 = vst [vmem:[#allocation62_spill] sm:$0xff] %v2291_v7  ;;  %v2297_v3 = vmul.f32 100.0, %v140_v55  ;;  %v2301_v34 = vmul.f32 100.0, %v141_v4  ;;  %v2303_v38 = vmul.f32 100.0, %v142_v0  ;;  %vm46_vm1 = vcmask 23552  }
  0x48   :  { %v262_v9 = vmax.f32 %v260_v37, %v2277_v54  ;;  %v263_v39 = vmax.f32 %v261_v50, %v2279_v45  ;;  %4265 = vst [vmem:[#allocation63_spill] sm:$0xff] %v2295_v58  ;;  %v2307_v37 = vmul.f32 100.0, %v143_v51  ;;  %v2309_v50 = vmul.f32 100.0, %v144_v15  ;;  %v2317_v51 = vld [vmem:[#allocation2] sm:$0xff]  ;;  %v2391_v45 = vld [vmem:[#allocation7 + $0x58] sm:$0x77] }
  0x49   :  { %4266 = vst [vmem:[#allocation64_spill] sm:$0xff] %v2297_v3  ;;  %4267 = vst [vmem:[#allocation65_spill] sm:$0xff] %v2301_v34 }
  0x4a   :  { %v264_v46 = vmax.f32 %v262_v9, %v2283_v36  ;;  %v265_v56 = vmax.f32 %v263_v39, %v2285_v20  ;;  %4268 = vst [vmem:[#allocation66_spill] sm:$0xff] %v2303_v38  ;;  %4269 = vst [vmem:[#allocation67_spill] sm:$0xff] %v2307_v37  ;;  %v2100_v39 = vmov 0   ;;  %v2389_v36 = vld [vmem:[#allocation7 + $0x50] sm:$0x77] }
  0x4b   :  { %4270 = vst [vmem:[#allocation68_spill] sm:$0xff] %v2309_v50  ;;  %1913 = vset.pattern.permute.xlu1 %v2100_v39  ;;  %1914 = vset.pattern.permute.xlu0 %v2100_v39  ;;  %4271 = vst [vmem:[#allocation69_spill] sm:$0xff] %v2317_v51 }
  0x4c   :  { %v266_v35 = vmax.f32 %v264_v46, %v2289_v57  ;;  %v267_v21 = vmax.f32 %v265_v56, %v2291_v7 }
  0x4e   :  { %v268_v40 = vmax.f32 %v266_v35, %v2295_v58  ;;  %v269_v49 = vmax.f32 %v267_v21, %v2297_v3  ;;  %v3946_v21 = vmov 0.0   ;;  %v2353_v35 = vld [vmem:[#allocation7 + $0x18] sm:$0x77]  ;;  %v2379_v3 = vld [vmem:[#allocation7 + $0x48] sm:$0x77] }
  0x4f   :  { %44 = vst.msk [vmem:[#allocation3] sm:$0xff] %vm41_vm0, %v3946_v21  ;;  %45 = vst.msk [vmem:[#allocation3 + $0x8] sm:$0xff] %vm41_vm0, %v3946_v21 }
  0x50   :  { %v270_v55 = vmax.f32 %v268_v40, %v2301_v34  ;;  %v271_v9 = vmax.f32 %v269_v49, %v2303_v38  ;;  %v2331_v40 = vld [vmem:[#allocation2 + $0x8] sm:$0xff]  ;;  %v2377_v34 = vld [vmem:[#allocation7 + $0x40] sm:$0x77] }
  0x51   :  { %4273 = vst [vmem:[#allocation71_spill] sm:$0xff] %v2331_v40 }
  0x52   :  { %v272_v4 = vmax.f32 %v270_v55, %v2307_v37  ;;  %v273_v0 = vmax.f32 %v271_v9, %v2309_v50  ;;  %v2358_v9 = vld [vmem:[#allocation7 + $0x20] sm:$0x77] }
  0x54   :  { %v274_v46 = vmax.f32 %v272_v4, %v273_v0  ;;  %v3949_v4 = vlaneseq }
  0x56   :  { %275 = vmax.xlane.f32.xlu0 %v274_v46  ;;  %v2342_v0 = vshrl.u32 %v3949_v4, 7  ;;  %v2347_v46 = vld [vmem:[#allocation7] sm:$0x77] }
  0x58   :  { %v2345_v39 = vsub.s32 2, %v2342_v0  ;;  %v2356_v21 = vsub.s32 6, %v2342_v0  ;;  %v2363_v4 = vsub.s32 0, %v2342_v0 }
  0x5a   :  { %v1362_v50 = vrot.slane %v2347_v46, %v2356_v21  ;;  %v1382_v57 = vrot.slane %v2353_v35, %v2345_v39  ;;  %v1386_v20 = vrot.slane %v2353_v35, %v2356_v21  ;;  %v1390_v54 = vrot.slane %v2358_v9, %v2345_v39 }
  0x5b   :  { %v1394_v63 = vrot.slane %v2358_v9, %v2356_v21  ;;  %v1422_v44 = vrot.slane %v2377_v34, %v2345_v39  ;;  %v1426_v41 = vrot.slane %v2377_v34, %v2356_v21  ;;  %v1430_v30 = vrot.slane %v2379_v3, %v2345_v39 }
  0x5c   :  { %v1434_v29 = vrot.slane %v2379_v3, %v2356_v21  ;;  %v1438_v28 = vrot.slane %v2389_v36, %v2345_v39  ;;  %v1442_v27 = vrot.slane %v2389_v36, %v2356_v21  ;;  %v1446_v26 = vrot.slane %v2391_v45, %v2345_v39 }
  0x5d   :  { %v1450_v23 = vrot.slane %v2391_v45, %v2356_v21  ;;  %v1454_v14 = vrot.slane %v2401_v31, %v2345_v39  ;;  %v1458_v13 = vrot.slane %v2401_v31, %v2356_v21  ;;  %v1462_v12 = vrot.slane %v2403_v22, %v2345_v39 }
  0x5e   :  { %v1466_v11 = vrot.slane %v2403_v22, %v2356_v21  ;;  %v1470_v6 = vrot.slane %v2413_v48, %v2345_v39  ;;  %v1474_v5 = vrot.slane %v2413_v48, %v2356_v21  ;;  %v1478_v62 = vrot.slane %v2415_v47, %v2345_v39 }
  0x5f   :  { %v1482_v61 = vrot.slane %v2415_v47, %v2356_v21  ;;  %v2453_v52 = vrot.slane %v1362_v50, %v2345_v39  ;;  %v2474_v50 = vrot.slane %v1390_v54, %v2345_v39 }
  0x61   :  { %4276 = vst [vmem:[#allocation74_spill] sm:$0xff] %v2453_v52  ;;  %4283 = vst [vmem:[#allocation81_spill] sm:$0xff] %v2474_v50  ;;  %v642_v50 = vrot.slane %v2415_v47, %v2363_v4 }
  0xca   :  { %v243_v15 = vpop.xlane.xlu0 %242 }
  0xcb   :  { %v2320_v56 = vmax.f32 %v2317_v51, %v243_v15  ;;  %v2349_v15 = vld [vmem:[#allocation7 + $0x8] sm:$0x77]  ;;  %v2365_v51 = vld [vmem:[#allocation7 + $0x30] sm:$0x77] }
  0xcc   :  { %v1366_v37 = vrot.slane %v2349_v15, %v2345_v39  ;;  %v1370_v38 = vrot.slane %v2349_v15, %v2356_v21  ;;  %v1406_v60 = vrot.slane %v2365_v51, %v2345_v39  ;;  %v1410_v59 = vrot.slane %v2365_v51, %v2356_v21 }
  0xcd   :  { %4272 = vst [vmem:[#allocation70_spill] sm:$0xff] %v2320_v56  ;;  %1875 = vst.msk [vmem:[#allocation2] sm:$0xff] %vm41_vm0, %v2320_v56  ;;  %287 = vperm.xlu1 %1913, %v2320_v56   ;;  %v2360_v56 = vld [vmem:[#allocation7 + $0x28] sm:$0x77] }
  0xce   :  { %v1398_v8 = vrot.slane %v2360_v56, %v2345_v39  ;;  %v1402_v10 = vrot.slane %v2360_v56, %v2356_v21  ;;  %v2456_v43 = vrot.slane %v1366_v37, %v2345_v39  ;;  %v2459_v42 = vrot.slane %v1370_v38, %v2345_v39 }
  0xcf   :  { %v2477_v37 = vrot.slane %v1394_v63, %v2345_v39  ;;  %v2498_v63 = vrot.slane %v1422_v44, %v2345_v39  ;;  %v2519_v44 = vrot.slane %v1450_v23, %v2345_v39  ;;  %v2540_v23 = vrot.slane %v1478_v62, %v2345_v39 }
  0xd0   :  { %4277 = vst [vmem:[#allocation75_spill] sm:$0xff] %v2456_v43  ;;  %4278 = vst [vmem:[#allocation76_spill] sm:$0xff] %v2459_v42  ;;  %v2480_v38 = vrot.slane %v1398_v8, %v2345_v39  ;;  %v2501_v8 = vrot.slane %v1426_v41, %v2345_v39  ;;  %v2522_v41 = vrot.slane %v1454_v14, %v2345_v39 }
  0xd1   :  { %4284 = vst [vmem:[#allocation82_spill] sm:$0xff] %v2477_v37  ;;  %4291 = vst [vmem:[#allocation89_spill] sm:$0xff] %v2498_v63  ;;  %v2543_v14 = vrot.slane %v1482_v61, %v2345_v39  ;;  %v610_v63 = vrot.slane %v2391_v45, %v2363_v4 }
  0xd2   :  { %4285 = vst [vmem:[#allocation83_spill] sm:$0xff] %v2480_v38  ;;  %4292 = vst [vmem:[#allocation90_spill] sm:$0xff] %v2501_v8  ;;  %v634_v38 = vrot.slane %v2413_v48, %v2363_v4 }
  0xd3   :  { %4298 = vst [vmem:[#allocation96_spill] sm:$0xff] %v2519_v44  ;;  %4299 = vst [vmem:[#allocation97_spill] sm:$0xff] %v2522_v41 }
  0xd4   :  { %4305 = vst [vmem:[#allocation103_spill] sm:$0xff] %v2540_v23  ;;  %4306 = vst [vmem:[#allocation104_spill] sm:$0xff] %v2543_v14  ;;  %v554_v23 = vrot.slane %v2358_v9, %v2363_v4 }
  0xdf   :  { %v276_v49 = vpop.xlane.xlu0 %275 }
  0xe0   :  { %v2334_v55 = vmax.f32 %v2331_v40, %v276_v49  ;;  %v2351_v49 = vld [vmem:[#allocation7 + $0x10] sm:$0x77]  ;;  %v1358_v40 = vrot.slane %v2347_v46, %v2345_v39 }
  0xe1   :  { %v1374_v58 = vrot.slane %v2351_v49, %v2345_v39  ;;  %v1378_v7 = vrot.slane %v2351_v49, %v2356_v21  ;;  %v538_v62 = vrot.slane %v2351_v49, %v2363_v4 }
  0xe2   :  { %4274 = vst [vmem:[#allocation72_spill] sm:$0xff] %v2334_v55  ;;  %1876 = vst.msk [vmem:[#allocation2 + $0x8] sm:$0xff] %vm41_vm0, %v2334_v55  ;;  %292 = vperm.xlu1 %1913, %v2334_v55   ;;  %v2367_v55 = vld [vmem:[#allocation7 + $0x38] sm:$0x77]  ;;  %v2450_v53 = vrot.slane %v1358_v40, %v2345_v39  ;;  %v2471_v40 = vrot.slane %v1386_v20, %v2345_v39 }
  0xe3   :  { %v1414_v2 = vrot.slane %v2367_v55, %v2345_v39  ;;  %v1418_v1 = vrot.slane %v2367_v55, %v2356_v21  ;;  %v2462_v33 = vrot.slane %v1374_v58, %v2345_v39  ;;  %v2465_v32 = vrot.slane %v1378_v7, %v2345_v39 }
  0xe4   :  { %4275 = vst [vmem:[#allocation73_spill] sm:$0xff] %v2450_v53  ;;  %v2468_v21 = vrot.slane %v1382_v57, %v2345_v39  ;;  %4282 = vst [vmem:[#allocation80_spill] sm:$0xff] %v2471_v40  ;;  %v2483_v58 = vrot.slane %v1402_v10, %v2345_v39  ;;  %v2486_v7 = vrot.slane %v1406_v60, %v2345_v39 }
  0xe5   :  { %4279 = vst [vmem:[#allocation77_spill] sm:$0xff] %v2462_v33  ;;  %4280 = vst [vmem:[#allocation78_spill] sm:$0xff] %v2465_v32  ;;  %v2489_v57 = vrot.slane %v1410_v59, %v2345_v39  ;;  %v2492_v20 = vrot.slane %v1414_v2, %v2345_v39  ;;  %v2495_v54 = vrot.slane %v1418_v1, %v2345_v39 }
  0xe6   :  { %4281 = vst [vmem:[#allocation79_spill] sm:$0xff] %v2468_v21  ;;  %4286 = vst [vmem:[#allocation84_spill] sm:$0xff] %v2483_v58  ;;  %v2504_v10 = vrot.slane %v1430_v30, %v2345_v39  ;;  %v2507_v60 = vrot.slane %v1434_v29, %v2345_v39  ;;  %v2510_v59 = vrot.slane %v1438_v28, %v2345_v39 }
  0xe7   :  { %4287 = vst [vmem:[#allocation85_spill] sm:$0xff] %v2486_v7  ;;  %4288 = vst [vmem:[#allocation86_spill] sm:$0xff] %v2489_v57  ;;  %v2513_v2 = vrot.slane %v1442_v27, %v2345_v39  ;;  %v2516_v1 = vrot.slane %v1446_v26, %v2345_v39  ;;  %v2525_v30 = vrot.slane %v1458_v13, %v2345_v39  ;;  %v2546_v13 = vsub.s32 4, %v2342_v0 }
  0xe8   :  { %4289 = vst [vmem:[#allocation87_spill] sm:$0xff] %v2492_v20  ;;  %4290 = vst [vmem:[#allocation88_spill] sm:$0xff] %v2495_v54  ;;  %v2528_v29 = vrot.slane %v1462_v12, %v2345_v39  ;;  %v2531_v28 = vrot.slane %v1466_v11, %v2345_v39  ;;  %v2534_v27 = vrot.slane %v1470_v6, %v2345_v39 }
  0xe9   :  { %4293 = vst [vmem:[#allocation91_spill] sm:$0xff] %v2504_v10  ;;  %4294 = vst [vmem:[#allocation92_spill] sm:$0xff] %v2507_v60  ;;  %v2537_v26 = vrot.slane %v1474_v5, %v2345_v39  ;;  %v522_v12 = vrot.slane %v2347_v46, %v2363_v4  ;;  %v526_v11 = vrot.slane %v2347_v46, %v2546_v13 }
  0xea   :  { %4295 = vst [vmem:[#allocation93_spill] sm:$0xff] %v2510_v59  ;;  %4296 = vst [vmem:[#allocation94_spill] sm:$0xff] %v2513_v2  ;;  %v530_v6 = vrot.slane %v2349_v15, %v2363_v4  ;;  %v534_v5 = vrot.slane %v2349_v15, %v2546_v13  ;;  %v542_v61 = vrot.slane %v2351_v49, %v2546_v13 }
  0xeb   :  { %4297 = vst [vmem:[#allocation95_spill] sm:$0xff] %v2516_v1  ;;  %4300 = vst [vmem:[#allocation98_spill] sm:$0xff] %v2525_v30  ;;  %v546_v39 = vrot.slane %v2353_v35, %v2363_v4  ;;  %v550_v14 = vrot.slane %v2353_v35, %v2546_v13  ;;  %v574_v30 = vrot.slane %v2365_v51, %v2546_v13 }
  0xec   :  { %4301 = vst [vmem:[#allocation99_spill] sm:$0xff] %v2528_v29  ;;  %4302 = vst [vmem:[#allocation100_spill] sm:$0xff] %v2531_v28  ;;  %v566_v28 = vrot.slane %v2360_v56, %v2546_v13  ;;  %v570_v29 = vrot.slane %v2365_v51, %v2363_v4  ;;  %v578_v41 = vrot.slane %v2367_v55, %v2363_v4 }
  0xed   :  { %4303 = vst [vmem:[#allocation101_spill] sm:$0xff] %v2534_v27  ;;  %4304 = vst [vmem:[#allocation102_spill] sm:$0xff] %v2537_v26  ;;  %v558_v26 = vrot.slane %v2358_v9, %v2546_v13  ;;  %v562_v27 = vrot.slane %v2360_v56, %v2363_v4  ;;  %v582_v44 = vrot.slane %v2367_v55, %v2546_v13 }
  0xee   :  { %v586_v1 = vrot.slane %v2377_v34, %v2363_v4  ;;  %v590_v2 = vrot.slane %v2377_v34, %v2546_v13  ;;  %v594_v59 = vrot.slane %v2379_v3, %v2363_v4  ;;  %v598_v60 = vrot.slane %v2379_v3, %v2546_v13 }
  0xef   :  { %v602_v10 = vrot.slane %v2389_v36, %v2363_v4  ;;  %v606_v8 = vrot.slane %v2389_v36, %v2546_v13  ;;  %v614_v54 = vrot.slane %v2391_v45, %v2546_v13  ;;  %v618_v20 = vrot.slane %v2401_v31, %v2363_v4 }
  0xf0   :  { %v622_v57 = vrot.slane %v2401_v31, %v2546_v13  ;;  %v626_v7 = vrot.slane %v2403_v22, %v2363_v4  ;;  %v630_v58 = vrot.slane %v2403_v22, %v2546_v13  ;;  %v638_v37 = vrot.slane %v2413_v48, %v2546_v13 }
  0xf1   :  { %v646_v40 = vrot.slane %v2415_v47, %v2546_v13  ;;  %v2613_v21 = vrot.slane %v522_v12, %v2363_v4  ;;  %v2616_v32 = vrot.slane %v526_v11, %v2363_v4  ;;  %v2619_v33 = vrot.slane %v530_v6, %v2363_v4 }
  0xf2   :  { %v2622_v42 = vrot.slane %v534_v5, %v2363_v4  ;;  %v2625_v43 = vrot.slane %v538_v62, %v2363_v4  ;;  %v2628_v52 = vrot.slane %v542_v61, %v2363_v4  ;;  %v2631_v13 = vrot.slane %v546_v39, %v2363_v4 }
  0xf3   :  { %4307 = vst [vmem:[#allocation105_spill] sm:$0xff] %v2613_v21  ;;  %4308 = vst [vmem:[#allocation106_spill] sm:$0xff] %v2616_v32  ;;  %v2634_v12 = vrot.slane %v550_v14, %v2363_v4  ;;  %v2637_v11 = vrot.slane %v554_v23, %v2363_v4  ;;  %v2640_v6 = vrot.slane %v558_v26, %v2363_v4  ;;  %v4386_v32 = vld [vmem:[#allocation32_spill] sm:$0xff]  ;;  %v4388_v21 = vld [vmem:[#allocation34_spill] sm:$0xff] }
  0xf4   :  { %4309 = vst [vmem:[#allocation107_spill] sm:$0xff] %v2619_v33  ;;  %4310 = vst [vmem:[#allocation108_spill] sm:$0xff] %v2622_v42  ;;  %v2643_v5 = vrot.slane %v562_v27, %v2363_v4  ;;  %v2646_v62 = vrot.slane %v566_v28, %v2363_v4  ;;  %v2649_v61 = vrot.slane %v570_v29, %v2363_v4  ;;  %v4384_v42 = vld [vmem:[#allocation30_spill] sm:$0xff]  ;;  %v4385_v33 = vld [vmem:[#allocation31_spill] sm:$0xff] }
  0xf5   :  { %4311 = vst [vmem:[#allocation109_spill] sm:$0xff] %v2625_v43  ;;  %4312 = vst [vmem:[#allocation110_spill] sm:$0xff] %v2628_v52  ;;  %v2652_v39 = vrot.slane %v574_v30, %v2363_v4  ;;  %v2655_v14 = vrot.slane %v578_v41, %v2363_v4  ;;  %v2658_v23 = vrot.slane %v582_v44, %v2363_v4  ;;  %v4382_v52 = vld [vmem:[#allocation28_spill] sm:$0xff]  ;;  %v4383_v43 = vld [vmem:[#allocation29_spill] sm:$0xff] }
  0xf6   :  { %4313 = vst [vmem:[#allocation111_spill] sm:$0xff] %v2631_v13  ;;  %4314 = vst [vmem:[#allocation112_spill] sm:$0xff] %v2634_v12  ;;  %v2661_v26 = vrot.slane %v586_v1, %v2363_v4  ;;  %v2664_v27 = vrot.slane %v590_v2, %v2363_v4  ;;  %v2667_v28 = vrot.slane %v594_v59, %v2363_v4  ;;  %v4379_v12 = vld [vmem:[#allocation25_spill] sm:$0xff]  ;;  %v4380_v13 = vld [vmem:[#allocation26_spill] sm:$0xff] }
  0xf7   :  { %4315 = vst [vmem:[#allocation113_spill] sm:$0xff] %v2637_v11  ;;  %4316 = vst [vmem:[#allocation114_spill] sm:$0xff] %v2640_v6  ;;  %v2670_v29 = vrot.slane %v598_v60, %v2363_v4  ;;  %v2673_v30 = vrot.slane %v602_v10, %v2363_v4  ;;  %v2676_v41 = vrot.slane %v606_v8, %v2363_v4  ;;  %v4377_v6 = vld [vmem:[#allocation23_spill] sm:$0xff]  ;;  %v4378_v11 = vld [vmem:[#allocation24_spill] sm:$0xff] }
  0xf8   :  { %4317 = vst [vmem:[#allocation115_spill] sm:$0xff] %v2643_v5  ;;  %4318 = vst [vmem:[#allocation116_spill] sm:$0xff] %v2646_v62  ;;  %v2679_v44 = vrot.slane %v610_v63, %v2363_v4  ;;  %v2682_v1 = vrot.slane %v614_v54, %v2363_v4  ;;  %v2685_v2 = vrot.slane %v618_v20, %v2363_v4  ;;  %v4374_v62 = vld [vmem:[#allocation20_spill] sm:$0xff]  ;;  %v4376_v5 = vld [vmem:[#allocation22_spill] sm:$0xff] }
  0xf9   :  { %4319 = vst [vmem:[#allocation117_spill] sm:$0xff] %v2649_v61  ;;  %4320 = vst [vmem:[#allocation118_spill] sm:$0xff] %v2652_v39  ;;  %v2688_v59 = vrot.slane %v622_v57, %v2363_v4  ;;  %v2691_v60 = vrot.slane %v626_v7, %v2363_v4  ;;  %v2694_v10 = vrot.slane %v630_v58, %v2363_v4  ;;  %v2709_v57 = vsub.s32 1, %v2342_v0  ;;  %v4373_v61 = vld [vmem:[#allocation19_spill] sm:$0xff] }
  0xfa   :  { %4321 = vst [vmem:[#allocation119_spill] sm:$0xff] %v2655_v14  ;;  %4322 = vst [vmem:[#allocation120_spill] sm:$0xff] %v2658_v23  ;;  %v2697_v8 = vrot.slane %v634_v38, %v2363_v4  ;;  %v2700_v63 = vrot.slane %v638_v37, %v2363_v4  ;;  %v2703_v54 = vrot.slane %v642_v50, %v2363_v4  ;;  %v2712_v7 = vsub.s32 5, %v2342_v0 }
  0xfb   :  { %4323 = vst [vmem:[#allocation121_spill] sm:$0xff] %v2661_v26  ;;  %4324 = vst [vmem:[#allocation122_spill] sm:$0xff] %v2664_v27  ;;  %v2706_v20 = vrot.slane %v646_v40, %v2363_v4  ;;  %v940_v58 = vrot.slane %v2347_v46, %v2709_v57  ;;  %v948_v37 = vrot.slane %v2349_v15, %v2709_v57 }
  0xfc   :  { %4325 = vst [vmem:[#allocation123_spill] sm:$0xff] %v2667_v28  ;;  %4326 = vst [vmem:[#allocation124_spill] sm:$0xff] %v2670_v29  ;;  %v944_v38 = vrot.slane %v2347_v46, %v2712_v7  ;;  %v952_v50 = vrot.slane %v2349_v15, %v2712_v7  ;;  %v956_v4 = vrot.slane %v2351_v49, %v2709_v57 }
  0xfd   :  { %4327 = vst [vmem:[#allocation125_spill] sm:$0xff] %v2673_v30  ;;  %4328 = vst [vmem:[#allocation126_spill] sm:$0xff] %v2676_v41  ;;  %v960_v40 = vrot.slane %v2351_v49, %v2712_v7  ;;  %v964_v0 = vrot.slane %v2353_v35, %v2709_v57  ;;  %v972_v46 = vrot.slane %v2358_v9, %v2709_v57 }
  0xfe   :  { %4329 = vst [vmem:[#allocation127_spill] sm:$0xff] %v2679_v44  ;;  %4330 = vst [vmem:[#allocation128_spill] sm:$0xff] %v2682_v1  ;;  %v980_v15 = vrot.slane %v2360_v56, %v2709_v57  ;;  %v988_v49 = vrot.slane %v2365_v51, %v2709_v57  ;;  %v1032_v1 = vrot.slane %v2391_v45, %v2712_v7 }
  0xff   :  { %4331 = vst [vmem:[#allocation129_spill] sm:$0xff] %v2685_v2  ;;  %4332 = vst [vmem:[#allocation130_spill] sm:$0xff] %v2688_v59  ;;  %v1016_v59 = vrot.slane %v2379_v3, %v2712_v7  ;;  %v1024_v2 = vrot.slane %v2389_v36, %v2712_v7  ;;  %v1040_v44 = vrot.slane %v2401_v31, %v2712_v7 }
 0x100   :  { %4333 = vst [vmem:[#allocation131_spill] sm:$0xff] %v2691_v60  ;;  %4334 = vst [vmem:[#allocation132_spill] sm:$0xff] %v2694_v10  ;;  %v1000_v10 = vrot.slane %v2367_v55, %v2712_v7  ;;  %v1008_v60 = vrot.slane %v2377_v34, %v2712_v7  ;;  %v1052_v30 = vrot.slane %v2413_v48, %v2709_v57 }
 0x101   :  { %4335 = vst [vmem:[#allocation133_spill] sm:$0xff] %v2697_v8  ;;  %4336 = vst [vmem:[#allocation134_spill] sm:$0xff] %v2700_v63  ;;  %v984_v63 = vrot.slane %v2360_v56, %v2712_v7  ;;  %v992_v8 = vrot.slane %v2365_v51, %v2712_v7  ;;  %v1012_v56 = vrot.slane %v2379_v3, %v2709_v57 }
 0x102   :  { %4337 = vst [vmem:[#allocation135_spill] sm:$0xff] %v2703_v54  ;;  %4338 = vst [vmem:[#allocation136_spill] sm:$0xff] %v2706_v20  ;;  %v968_v20 = vrot.slane %v2353_v35, %v2712_v7  ;;  %v976_v54 = vrot.slane %v2358_v9, %v2712_v7  ;;  %v996_v35 = vrot.slane %v2367_v55, %v2709_v57 }
 0x103   :  { %v1004_v9 = vrot.slane %v2377_v34, %v2709_v57  ;;  %v1020_v51 = vrot.slane %v2389_v36, %v2709_v57  ;;  %v1028_v55 = vrot.slane %v2391_v45, %v2709_v57  ;;  %v1036_v34 = vrot.slane %v2401_v31, %v2709_v57 }
 0x104   :  { %v1044_v3 = vrot.slane %v2403_v22, %v2709_v57  ;;  %v1048_v36 = vrot.slane %v2403_v22, %v2712_v7  ;;  %v1056_v45 = vrot.slane %v2413_v48, %v2712_v7  ;;  %v1060_v29 = vrot.slane %v2415_v47, %v2709_v57 }
 0x105   :  { %v1064_v31 = vrot.slane %v2415_v47, %v2712_v7  ;;  %v2781_v28 = vrot.slane %v940_v58, %v2709_v57  ;;  %v2784_v27 = vrot.slane %v944_v38, %v2709_v57  ;;  %v2787_v22 = vrot.slane %v948_v37, %v2709_v57 }
 0x106   :  { %v2790_v26 = vrot.slane %v952_v50, %v2709_v57  ;;  %v2793_v48 = vrot.slane %v956_v4, %v2709_v57  ;;  %v2796_v23 = vrot.slane %v960_v40, %v2709_v57  ;;  %v2805_v38 = vrot.slane %v964_v0, %v2709_v57 }
 0x107   :  { %4339 = vst [vmem:[#allocation137_spill] sm:$0xff] %v2781_v28  ;;  %4340 = vst [vmem:[#allocation138_spill] sm:$0xff] %v2784_v27  ;;  %v2810_v50 = vrot.slane %v968_v20, %v2709_v57  ;;  %v2813_v4 = vrot.slane %v972_v46, %v2709_v57  ;;  %v2825_v40 = vrot.slane %v988_v49, %v2709_v57 }
 0x108   :  { %v2833_v0 = vrot.slane %v996_v35, %v2709_v57  ;;  %v2839_v46 = vrot.slane %v1004_v9, %v2709_v57  ;;  %v2842_v49 = vrot.slane %v1008_v60, %v2709_v57  ;;  %v2850_v35 = vrot.slane %v1016_v59, %v2709_v57 }
 0x109   :  { %4341 = vst [vmem:[#allocation139_spill] sm:$0xff] %v2813_v4  ;;  %4345 = vst [vmem:[#allocation143_spill] sm:$0xff] %v2825_v40  ;;  %v2856_v9 = vrot.slane %v1024_v2, %v2709_v57  ;;  %v2859_v60 = vrot.slane %v1028_v55, %v2709_v57  ;;  %v2867_v59 = vrot.slane %v1036_v34, %v2709_v57  ;;  %v4361_v55 = vld [vmem:[#allocation12_spill] sm:$0xff] }
 0x10a   :  { %4347 = vst [vmem:[#allocation145_spill] sm:$0xff] %v2833_v0  ;;  %4349 = vst [vmem:[#allocation147_spill] sm:$0xff] %v2839_v46  ;;  %v2873_v2 = vrot.slane %v1044_v3, %v2709_v57  ;;  %v2890_v34 = vrot.slane %v1064_v31, %v2709_v57  ;;  %v4367_v3 = vld [vmem:[#allocation13_spill] sm:$0xff] }
 0x10b   :  { %4350 = vst [vmem:[#allocation148_spill] sm:$0xff] %v2842_v49  ;;  %4352 = vst [vmem:[#allocation150_spill] sm:$0xff] %v2850_v35 }
 0x10c   :  { %4354 = vst [vmem:[#allocation152_spill] sm:$0xff] %v2856_v9  ;;  %4355 = vst [vmem:[#allocation153_spill] sm:$0xff] %v2859_v60 }
 0x10d   :  { %4358 = vst [vmem:[#allocation154_spill] sm:$0xff] %v2867_v59  ;;  %4360 = vst [vmem:[#allocation156_spill] sm:$0xff] %v2873_v2 }
 0x10e   :  { %4366 = vst [vmem:[#allocation160_spill] sm:$0xff] %v2890_v34 }
 0x148   :  { %v2766_v41 = vpop.permute.xlu1 %287 }
 0x149   :  { %v295_v47 = vsub.f32 %v2125_v16, %v2766_v41  ;;  %v296_v7 = vsub.f32 %v2127_v17, %v2766_v41  ;;  %v297_v58 = vsub.f32 %v2129_v18, %v2766_v41  ;;  %v298_v37 = vsub.f32 %v2131_v19, %v2766_v41 }
 0x14a   :  { %v2816_v16 = vrot.slane %v976_v54, %v2709_v57  ;;  %v2819_v17 = vrot.slane %v980_v15, %v2709_v57  ;;  %v2822_v18 = vrot.slane %v984_v63, %v2709_v57  ;;  %v2828_v19 = vrot.slane %v992_v8, %v2709_v57 }
 0x14b   :  { %v299_v20 = vsub.f32 %v2133_v24, %v2766_v41  ;;  %v2836_v54 = vrot.slane %v1000_v10, %v2709_v57  ;;  %v359_v63 = vmul.f32 1.442695, %v295_v47  ;;  %v361_v15 = vmul.f32 1.442695, %v296_v7  ;;  %v4356_v47 = vld [vmem:[#allocation11_spill] sm:$0xff] }
 0x14c   :  { %4342 = vst [vmem:[#allocation140_spill] sm:$0xff] %v2816_v16  ;;  %4343 = vst [vmem:[#allocation141_spill] sm:$0xff] %v2819_v17  ;;  %v363_v14 = vmul.f32 1.442695, %v297_v58  ;;  %v300_v8 = vsub.f32 %v2135_v25, %v2766_v41  ;;  %v365_v39 = vmul.f32 1.442695, %v298_v37  ;;  %v2847_v24 = vrot.slane %v1012_v56, %v2709_v57 }
 0x14d   :  { %4344 = vst [vmem:[#allocation142_spill] sm:$0xff] %v2822_v18  ;;  %4346 = vst [vmem:[#allocation144_spill] sm:$0xff] %v2828_v19  ;;  %1915 = vpow2.f32 %v359_v63  ;;  %v2853_v10 = vrot.slane %v1020_v51, %v2709_v57  ;;  %v301_v25 = vsub.f32 %v4356_v47, %v2766_v41  ;;  %v367_v7 = vmul.f32 1.442695, %v299_v20 }
 0x14e   :  { %4348 = vst [vmem:[#allocation146_spill] sm:$0xff] %v2836_v54  ;;  %4351 = vst [vmem:[#allocation149_spill] sm:$0xff] %v2847_v24  ;;  %1917 = vpow2.f32 %v361_v15  ;;  %v2864_v56 = vrot.slane %v1032_v1, %v2709_v57  ;;  %v2870_v51 = vrot.slane %v1040_v44, %v2709_v57  ;;  %v302_v58 = vsub.f32 %v4361_v55, %v2766_v41 }
 0x14f   :  { %4353 = vst [vmem:[#allocation151_spill] sm:$0xff] %v2853_v10  ;;  %1919 = vpow2.f32 %v363_v14  ;;  %v369_v37 = vmul.f32 1.442695, %v300_v8  ;;  %v2878_v20 = vrot.slane %v1048_v36, %v2709_v57  ;;  %v2881_v1 = vrot.slane %v1052_v30, %v2709_v57  ;;  %v4369_v30 = vld [vmem:[#allocation15_spill] sm:$0xff] }
 0x150   :  { %4357 = vst [vmem:[#allocation11_spill] sm:$0xff] %v2864_v56  ;;  %4359 = vst [vmem:[#allocation155_spill] sm:$0xff] %v2870_v51  ;;  %1921 = vpow2.f32 %v365_v39  ;;  %v2884_v14 = vrot.slane %v1056_v45, %v2709_v57  ;;  %v2887_v44 = vrot.slane %v1060_v29, %v2709_v57  ;;  %v303_v63 = vsub.f32 %v4367_v3, %v2766_v41  ;;  %v4368_v39 = vld [vmem:[#allocation14_spill] sm:$0xff]  ;;  %v4370_v45 = vld [vmem:[#allocation16_spill] sm:$0xff] }
 0x151   :  { %4362 = vst [vmem:[#allocation12_spill] sm:$0xff] %v2878_v20  ;;  %4363 = vst [vmem:[#allocation157_spill] sm:$0xff] %v2881_v1  ;;  %v304_v15 = vsub.f32 %v4368_v39, %v2766_v41  ;;  %1923 = vpow2.f32 %v367_v7  ;;  %v371_v36 = vmul.f32 1.442695, %v301_v25  ;;  %v305_v8 = vsub.f32 %v4369_v30, %v2766_v41  ;;  %v4371_v29 = vld [vmem:[#allocation17_spill] sm:$0xff]  ;;  %v4372_v57 = vld [vmem:[#allocation18_spill] sm:$0xff] }
 0x152   :  { %4364 = vst [vmem:[#allocation158_spill] sm:$0xff] %v2884_v14  ;;  %4365 = vst [vmem:[#allocation159_spill] sm:$0xff] %v2887_v44  ;;  %v306_v47 = vsub.f32 %v4370_v45, %v2766_v41  ;;  %v307_v55 = vsub.f32 %v4371_v29, %v2766_v41  ;;  %v308_v31 = vsub.f32 %v4372_v57, %v2766_v41  ;;  %1925 = vpow2.f32 %v369_v37  ;;  %v4375_v7 = vld [vmem:[#allocation21_spill] sm:$0xff]  ;;  %v4381_v37 = vld [vmem:[#allocation27_spill] sm:$0xff] }
 0x153   :  { %v309_v3 = vsub.f32 %v4373_v61, %v2766_v41  ;;  %v310_v39 = vsub.f32 %v4374_v62, %v2766_v41  ;;  %v373_v25 = vmul.f32 1.442695, %v302_v58  ;;  %v311_v30 = vsub.f32 %v4375_v7, %v2766_v41 }
 0x154   :  { %v312_v45 = vsub.f32 %v4376_v5, %v2766_v41  ;;  %v313_v29 = vsub.f32 %v4377_v6, %v2766_v41  ;;  %v314_v57 = vsub.f32 %v4378_v11, %v2766_v41  ;;  %v315_v61 = vsub.f32 %v4379_v12, %v2766_v41 }
 0x155   :  { %v316_v62 = vsub.f32 %v4380_v13, %v2766_v41  ;;  %1927 = vpow2.f32 %v371_v36  ;;  %v375_v58 = vmul.f32 1.442695, %v303_v63  ;;  %v317_v7 = vsub.f32 %v4381_v37, %v2766_v41  ;;  %v4387_v36 = vld [vmem:[#allocation33_spill] sm:$0xff] }
 0x156   :  { %v318_v5 = vsub.f32 %v4382_v52, %v2766_v41  ;;  %v319_v6 = vsub.f32 %v4383_v43, %v2766_v41  ;;  %v320_v11 = vsub.f32 %v4384_v42, %v2766_v41  ;;  %v321_v12 = vsub.f32 %v4385_v33, %v2766_v41 }
 0x157   :  { %v322_v13 = vsub.f32 %v4386_v32, %v2766_v41  ;;  %1929 = vpow2.f32 %v373_v25  ;;  %v377_v63 = vmul.f32 1.442695, %v304_v15  ;;  %v323_v37 = vsub.f32 %v4387_v36, %v2766_v41 }
 0x158   :  { %v324_v52 = vsub.f32 %v4388_v21, %v2766_v41  ;;  %v379_v53 = vmul.f32 1.442695, %v305_v8  ;;  %v381_v34 = vmul.f32 1.442695, %v306_v47  ;;  %1931 = vpow2.f32 %v375_v58 }
 0x159   :  { %v383_v42 = vmul.f32 1.442695, %v307_v55  ;;  %v385_v44 = vmul.f32 1.442695, %v308_v31  ;;  %v387_v14 = vmul.f32 1.442695, %v309_v3  ;;  %1933 = vpow2.f32 %v377_v63 }
 0x15a   :  { %v2936_v43 = vpop.eup %1915  ;;  %v389_v1 = vmul.f32 1.442695, %v310_v39  ;;  %v391_v32 = vmul.f32 1.442695, %v311_v30  ;;  %v393_v25 = vmul.f32 1.442695, %v312_v45  ;;  %1935 = vpow2.f32 %v379_v53 }
 0x15b   :  { %4389 = vst [vmem:[#allocation13_spill] sm:$0xff] %v2936_v43  ;;  %v2938_v33 = vpop.eup %1917  ;;  %v1225_v15 = vmul.f32 %v2936_v43, %v2781_v28  ;;  %v395_v21 = vmul.f32 1.442695, %v313_v29  ;;  %v4393_v31 = vld [vmem:[#allocation39_spill] sm:$0xff]  ;;  %v397_v39 = vmul.f32 1.442695, %v314_v57  ;;  %1937 = vpow2.f32 %v381_v34 }
 0x15c   :  { %4390 = vst [vmem:[#allocation14_spill] sm:$0xff] %v2938_v33  ;;  %v2942_v36 = vpop.eup %1919  ;;  %v1785_v8 = vadd.f32 %v2938_v33, %v2936_v43  ;;  %v1226_v47 = vmul.f32 %v2938_v33, %v2784_v27  ;;  %v325_v3 = vsub.f32 %v4393_v31, %v2766_v41  ;;  %v399_v30 = vmul.f32 1.442695, %v315_v61  ;;  %v4395_v43 = vld [vmem:[#allocation40_spill] sm:$0xff] }
 0x15d   :  { %4391 = vst [vmem:[#allocation15_spill] sm:$0xff] %v2942_v36  ;;  %v2948_v55 = vpop.eup %1921  ;;  %v401_v45 = vmul.f32 1.442695, %v316_v62  ;;  %v1227_v29 = vmul.f32 %v2942_v36, %v2787_v22  ;;  %v326_v33 = vsub.f32 %v4395_v43, %v2766_v41  ;;  %v403_v27 = vmul.f32 1.442695, %v317_v7  ;;  %v2966_v31 = vpop.permute.xlu1 %292 }
 0x15e   :  { %4392 = vst [vmem:[#allocation16_spill] sm:$0xff] %v2948_v55  ;;  %v1786_v58 = vadd.f32 %v2942_v36, %v1785_v8  ;;  %v1289_v63 = vadd.f32 %v1226_v47, %v1225_v15  ;;  %v2955_v28 = vpop.eup %1923  ;;  %v405_v20 = vmul.f32 1.442695, %v318_v5  ;;  %v407_v2 = vmul.f32 1.442695, %v319_v6 }
 0x15f   :  { %4394 = vst [vmem:[#allocation17_spill] sm:$0xff] %v2955_v28  ;;  %v1228_v53 = vmul.f32 %v2948_v55, %v2790_v26  ;;  %v2962_v62 = vpop.eup %1925  ;;  %1939 = vpow2.f32 %v383_v42  ;;  %v409_v8 = vmul.f32 1.442695, %v320_v11  ;;  %v411_v15 = vmul.f32 1.442695, %v321_v12 }
 0x160   :  { %v1787_v57 = vadd.f32 %v2948_v55, %v1786_v58  ;;  %v1290_v61 = vadd.f32 %v1289_v63, %v1227_v29  ;;  %4396 = vst [vmem:[#allocation18_spill] sm:$0xff] %v2962_v62  ;;  %v2964_v47 = vmul.f32 1.442695, %v322_v13  ;;  %1941 = vpow2.f32 %v385_v44  ;;  %v4428_v55 = vld [vmem:[#allocation56_spill] sm:$0xff] }
 0x161   :  { %v1229_v34 = vmul.f32 %v2955_v28, %v2793_v48  ;;  %1943 = vpow2.f32 %v387_v14  ;;  %v2973_v6 = vmul.f32 1.442695, %v323_v37  ;;  %v2975_v43 = vmul.f32 1.442695, %v324_v52  ;;  %v4399_v14 = vld [vmem:[#allocation35_spill] sm:$0xff]  ;;  %v4400_v52 = vld [vmem:[#allocation36_spill] sm:$0xff] }
 0x162   :  { %v1788_v41 = vadd.f32 %v2955_v28, %v1787_v57  ;;  %v1291_v7 = vadd.f32 %v1290_v61, %v1228_v53  ;;  %v2971_v5 = vpop.eup %1927  ;;  %v2977_v11 = vmul.f32 1.442695, %v325_v3  ;;  %1945 = vpow2.f32 %v389_v1  ;;  %v4403_v53 = vld [vmem:[#allocation38_spill] sm:$0xff] }
 0x163   :  { %4397 = vst [vmem:[#allocation19_spill] sm:$0xff] %v2971_v5  ;;  %v1230_v44 = vmul.f32 %v2962_v62, %v2796_v23  ;;  %1947 = vpow2.f32 %v391_v32  ;;  %v2984_v58 = vmul.f32 1.442695, %v326_v33  ;;  %v327_v37 = vsub.f32 %v4399_v14, %v2966_v31  ;;  %v4402_v32 = vld [vmem:[#allocation37_spill] sm:$0xff]  ;;  %v4407_v14 = vld [vmem:[#allocation43_spill] sm:$0xff] }
 0x164   :  { %v1789_v12 = vadd.f32 %v2962_v62, %v1788_v41  ;;  %v1292_v13 = vadd.f32 %v1291_v7, %v1229_v34  ;;  %v2982_v42 = vpop.eup %1929  ;;  %v328_v29 = vsub.f32 %v4400_v52, %v2966_v31  ;;  %1949 = vpow2.f32 %v393_v25  ;;  %v4404_v41 = vld [vmem:[#allocation41_spill] sm:$0xff]  ;;  %v4412_v52 = vld [vmem:[#allocation47_spill] sm:$0xff] }
 0x165   :  { %4398 = vst [vmem:[#allocation20_spill] sm:$0xff] %v2982_v42  ;;  %v1231_v3 = vmul.f32 %v2971_v5, %v2805_v38  ;;  %v2993_v57 = vpop.eup %1931  ;;  %1951 = vpow2.f32 %v395_v21  ;;  %v329_v33 = vsub.f32 %v4402_v32, %v2966_v31  ;;  %v1232_v7 = vmul.f32 %v2982_v42, %v2810_v50  ;;  %v4406_v21 = vld [vmem:[#allocation42_spill] sm:$0xff]  ;;  %v4408_v32 = vld [vmem:[#allocation44_spill] sm:$0xff] }
 0x166   :  { %v1790_v1 = vadd.f32 %v2971_v5, %v1789_v12  ;;  %v1293_v63 = vadd.f32 %v1292_v13, %v1230_v44  ;;  %4401 = vst [vmem:[#allocation21_spill] sm:$0xff] %v2993_v57  ;;  %1953 = vpow2.f32 %v397_v39  ;;  %v3004_v44 = vpop.eup %1933  ;;  %v4411_v13 = vld [vmem:[#allocation46_spill] sm:$0xff] }
 0x167   :  { %4405 = vst [vmem:[#allocation22_spill] sm:$0xff] %v3004_v44  ;;  %1955 = vpow2.f32 %v399_v30  ;;  %v4410_v30 = vld [vmem:[#allocation45_spill] sm:$0xff]  ;;  %v427_v36 = vmul.f32 1.442695, %v329_v33 }
 0x168   :  { %v1791_v25 = vadd.f32 %v2982_v42, %v1790_v1  ;;  %v1294_v12 = vadd.f32 %v1293_v63, %v1231_v3  ;;  %1957 = vpow2.f32 %v401_v45  ;;  %v1233_v1 = vmul.f32 %v2993_v57, %v2813_v4  ;;  %v3015_v3 = vpop.eup %1935  ;;  %v4415_v63 = vld [vmem:[#allocation49_spill] sm:$0xff]  ;;  %v4416_v42 = vld [vmem:[#allocation50_spill] sm:$0xff] }
 0x169   :  { %4409 = vst [vmem:[#allocation23_spill] sm:$0xff] %v3015_v3  ;;  %1959 = vpow2.f32 %v403_v27  ;;  %v4414_v27 = vld [vmem:[#allocation48_spill] sm:$0xff] }
 0x16a   :  { %v1792_v39 = vadd.f32 %v2993_v57, %v1791_v25  ;;  %v1295_v34 = vadd.f32 %v1294_v12, %v1232_v7  ;;  %1961 = vpow2.f32 %v405_v20  ;;  %v1234_v25 = vmul.f32 %v3004_v44, %v2816_v16  ;;  %v3026_v7 = vpop.eup %1937 }
 0x16b   :  { %4413 = vst [vmem:[#allocation24_spill] sm:$0xff] %v3026_v7  ;;  %1963 = vpow2.f32 %v407_v2  ;;  %v4419_v2 = vld [vmem:[#allocation51_spill] sm:$0xff]  ;;  %v425_v57 = vmul.f32 1.442695, %v328_v29  ;;  %v4433_v29 = vsub.f32 %v4403_v53, %v2966_v31 }
 0x16c   :  { %v1793_v45 = vadd.f32 %v3004_v44, %v1792_v39  ;;  %v1296_v61 = vadd.f32 %v1295_v34, %v1233_v1  ;;  %v3034_v5 = vpop.eup %1939  ;;  %1965 = vpow2.f32 %v409_v8  ;;  %v1235_v34 = vmul.f32 %v3015_v3, %v2819_v17  ;;  %v4443_v53 = vld [vmem:[#allocation63_spill] sm:$0xff] }
 0x16d   :  { %4417 = vst [vmem:[#allocation25_spill] sm:$0xff] %v3034_v5  ;;  %v3039_v1 = vpop.eup %1941  ;;  %1967 = vpow2.f32 %v411_v15  ;;  %v423_v44 = vmul.f32 1.442695, %v327_v37  ;;  %v4422_v15 = vld [vmem:[#allocation52_spill] sm:$0xff]  ;;  %v4423_v37 = vld [vmem:[#allocation53_spill] sm:$0xff] }
 0x16e   :  { %v1794_v20 = vadd.f32 %v3015_v3, %v1793_v45  ;;  %v1297_v39 = vadd.f32 %v1296_v61, %v1234_v25  ;;  %4418 = vst [vmem:[#allocation26_spill] sm:$0xff] %v3039_v1  ;;  %v3043_v28 = vpop.eup %1943  ;;  %1969 = vpow2.f32 %v2964_v47  ;;  %v1236_v45 = vmul.f32 %v3026_v7, %v2822_v18  ;;  %v4424_v25 = vld [vmem:[#allocation54_spill] sm:$0xff]  ;;  %v4431_v61 = vld [vmem:[#allocation57_spill] sm:$0xff] }
 0x16f   :  { %4420 = vst [vmem:[#allocation27_spill] sm:$0xff] %v3043_v28  ;;  %v3049_v3 = vpop.eup %1945  ;;  %1971 = vpow2.f32 %v2973_v6  ;;  %v4427_v6 = vld [vmem:[#allocation55_spill] sm:$0xff]  ;;  %v4438_v18 = vld [vmem:[#allocation61_spill] sm:$0xff] }
 0x170   :  { %v1795_v8 = vadd.f32 %v3026_v7, %v1794_v20  ;;  %v1298_v62 = vadd.f32 %v1297_v39, %v1235_v34  ;;  %4421 = vst [vmem:[#allocation28_spill] sm:$0xff] %v3049_v3  ;;  %v3058_v47 = vpop.eup %1947  ;;  %v1237_v34 = vmul.f32 %v3034_v5, %v2825_v40  ;;  %1973 = vpow2.f32 %v423_v44 }
 0x171   :  { %4425 = vst [vmem:[#allocation29_spill] sm:$0xff] %v3058_v47  ;;  %v3063_v7 = vpop.eup %1949  ;;  %1975 = vpow2.f32 %v425_v57  ;;  %v4432_v57 = vld [vmem:[#allocation58_spill] sm:$0xff] }
 0x172   :  { %v1796_v20 = vadd.f32 %v3034_v5, %v1795_v8  ;;  %v1299_v39 = vadd.f32 %v1298_v62, %v1236_v45  ;;  %4426 = vst [vmem:[#allocation30_spill] sm:$0xff] %v3063_v7  ;;  %v3069_v12 = vpop.eup %1951  ;;  %1977 = vpow2.f32 %v2975_v43  ;;  %v1238_v62 = vmul.f32 %v3039_v1, %v2828_v19  ;;  %v4437_v5 = vld [vmem:[#allocation60_spill] sm:$0xff] }
 0x173   :  { %4429 = vst [vmem:[#allocation31_spill] sm:$0xff] %v3069_v12  ;;  %v3075_v45 = vpop.eup %1953  ;;  %1979 = vpow2.f32 %v2977_v11  ;;  %v429_v43 = vmul.f32 1.442695, %v4433_v29  ;;  %v4435_v11 = vld [vmem:[#allocation59_spill] sm:$0xff]  ;;  %v4439_v29 = vsub.f32 %v4404_v41, %v2966_v31  ;;  %v1242_v41 = vmul.f32 %v3063_v7, %v2842_v49 }
 0x174   :  { %v1797_v8 = vadd.f32 %v3039_v1, %v1796_v20  ;;  %v1300_v44 = vadd.f32 %v1299_v39, %v1237_v34  ;;  %4430 = vst [vmem:[#allocation32_spill] sm:$0xff] %v3075_v45  ;;  %v3085_v40 = vpop.eup %1955  ;;  %v1239_v34 = vmul.f32 %v3043_v28, %v2833_v0  ;;  %1981 = vpow2.f32 %v427_v36  ;;  %v4446_v0 = vld [vmem:[#allocation64_spill] sm:$0xff] }
 0x175   :  { %4434 = vst [vmem:[#allocation33_spill] sm:$0xff] %v3085_v40  ;;  %v3092_v19 = vpop.eup %1957  ;;  %v1241_v36 = vmul.f32 %v3058_v47, %v2839_v46  ;;  %1983 = vpow2.f32 %v429_v43  ;;  %v1243_v43 = vmul.f32 %v3069_v12, %v2847_v24  ;;  %v4453_v24 = vld [vmem:[#allocation67_spill] sm:$0xff]  ;;  %v1245_v46 = vmul.f32 %v3085_v40, %v2853_v10 }
 0x176   :  { %v1798_v20 = vadd.f32 %v3043_v28, %v1797_v8  ;;  %v1301_v39 = vadd.f32 %v1300_v44, %v1238_v62  ;;  %4436 = vst [vmem:[#allocation34_spill] sm:$0xff] %v3092_v19  ;;  %v431_v8 = vmul.f32 1.442695, %v4439_v29  ;;  %v3101_v17 = vpop.eup %1959  ;;  %v1240_v44 = vmul.f32 %v3049_v3, %v2836_v54  ;;  %v4441_v28 = vld [vmem:[#allocation62_spill] sm:$0xff] }
 0x177   :  { %4440 = vst [vmem:[#allocation39_spill] sm:$0xff] %v3101_v17  ;;  %v3108_v33 = vpop.eup %1961  ;;  %v4444_v29 = vsub.f32 %v4406_v21, %v2966_v31  ;;  %1985 = vpow2.f32 %v2984_v58  ;;  %v4448_v21 = vsub.f32 %v4407_v14, %v2966_v31 }
 0x178   :  { %v1799_v62 = vadd.f32 %v3049_v3, %v1798_v20  ;;  %v1302_v1 = vadd.f32 %v1301_v39, %v1239_v34  ;;  %4442 = vst [vmem:[#allocation40_spill] sm:$0xff] %v3108_v33  ;;  %v3117_v16 = vpop.eup %1963  ;;  %1987 = vpow2.f32 %v431_v8  ;;  %v1244_v8 = vmul.f32 %v3075_v45, %v2850_v35 }
 0x179   :  { %v433_v20 = vmul.f32 1.442695, %v4444_v29  ;;  %4445 = vst [vmem:[#allocation35_spill] sm:$0xff] %v3117_v16  ;;  %v3123_v54 = vpop.eup %1965  ;;  %v435_v29 = vmul.f32 1.442695, %v4448_v21  ;;  %v4454_v21 = vsub.f32 %v4408_v32, %v2966_v31  ;;  %v1247_v32 = vmul.f32 %v3101_v17, %v2859_v60  ;;  %v4461_v60 = vld [vmem:[#allocation156_spill] sm:$0xff] }
 0x17a   :  { %v1800_v34 = vadd.f32 %v3058_v47, %v1799_v62  ;;  %v1303_v39 = vadd.f32 %v1302_v1, %v1240_v44  ;;  %4447 = vst [vmem:[#allocation36_spill] sm:$0xff] %v3123_v54  ;;  %v3132_v58 = vpop.eup %1967  ;;  %v4450_v44 = vld [vmem:[#allocation65_spill] sm:$0xff]  ;;  %v4451_v47 = vld [vmem:[#allocation66_spill] sm:$0xff]  ;;  %v1249_v4 = vmul.f32 %v3117_v16, %v2867_v59  ;;  %v4464_v59 = vld [vmem:[#allocation12_spill] sm:$0xff] }
 0x17b   :  { %4449 = vst [vmem:[#allocation37_spill] sm:$0xff] %v3132_v58  ;;  %v3139_v49 = vpop.eup %1969  ;;  %1989 = vpow2.f32 %v433_v20  ;;  %v1246_v20 = vmul.f32 %v3092_v19, %v2856_v9 }
 0x17c   :  { %v1801_v1 = vadd.f32 %v3063_v7, %v1800_v34  ;;  %v1304_v62 = vadd.f32 %v1303_v39, %v1241_v36  ;;  %4452 = vst [vmem:[#allocation38_spill] sm:$0xff] %v3139_v49  ;;  %v437_v34 = vmul.f32 1.442695, %v4454_v21  ;;  %v3148_v36 = vpop.eup %1971  ;;  %1991 = vpow2.f32 %v435_v29 }
 0x17d   :  { %4455 = vst [vmem:[#allocation41_spill] sm:$0xff] %v3148_v36  ;;  %v3155_v35 = vpop.eup %1973  ;;  %v4458_v21 = vsub.f32 %v4410_v30, %v2966_v31  ;;  %v1250_v29 = vmul.f32 %v3123_v54, %v2870_v51  ;;  %v3177_v30 = vmul.f32 %v3132_v58, %v4461_v60  ;;  %v4465_v51 = vsub.f32 %v4412_v52, %v2966_v31  ;;  %v4466_v60 = vld [vmem:[#allocation157_spill] sm:$0xff] }
 0x17e   :  { %v1802_v39 = vadd.f32 %v3069_v12, %v1801_v1  ;;  %v1305_v3 = vadd.f32 %v1304_v62, %v1242_v41  ;;  %4457 = vst [vmem:[#allocation42_spill] sm:$0xff] %v3155_v35  ;;  %v3164_v14 = vpop.eup %1975  ;;  %v1248_v62 = vmul.f32 %v3108_v33, %v2864_v56  ;;  %1993 = vpow2.f32 %v437_v34 }
 0x17f   :  { %v439_v1 = vmul.f32 1.442695, %v4458_v21  ;;  %4459 = vst [vmem:[#allocation43_spill] sm:$0xff] %v3164_v14  ;;  %v3171_v9 = vpop.eup %1977  ;;  %v443_v10 = vmul.f32 1.442695, %v4465_v51  ;;  %v3194_v34 = vmul.f32 %v3148_v36, %v4466_v60  ;;  %v4469_v60 = vsub.f32 %v4415_v63, %v2966_v31 }
 0x180   :  { %v1803_v41 = vadd.f32 %v3075_v45, %v1802_v39  ;;  %v1306_v12 = vadd.f32 %v1305_v3, %v1243_v43  ;;  %4460 = vst [vmem:[#allocation44_spill] sm:$0xff] %v3171_v9  ;;  %v4462_v39 = vsub.f32 %v4411_v13, %v2966_v31  ;;  %v3182_v45 = vpop.eup %1979  ;;  %v3187_v3 = vmul.f32 %v3139_v49, %v4464_v59  ;;  %v4470_v59 = vld [vmem:[#allocation159_spill] sm:$0xff] }
 0x181   :  { %4463 = vst [vmem:[#allocation45_spill] sm:$0xff] %v3182_v45  ;;  %1995 = vpow2.f32 %v439_v1  ;;  %v4467_v13 = vsub.f32 %v4414_v27, %v2966_v31  ;;  %v447_v1 = vmul.f32 1.442695, %v4469_v60  ;;  %v3213_v27 = vmul.f32 %v3182_v45, %v4470_v59 }
 0x182   :  { %v441_v21 = vmul.f32 1.442695, %v4462_v39  ;;  %v1804_v56 = vadd.f32 %v3085_v40, %v1803_v41  ;;  %v1307_v43 = vadd.f32 %v1306_v12, %v1244_v8  ;;  %v1818_v41 = vadd.f32 %v3164_v14, %v3155_v35  ;;  %v3201_v40 = vpop.eup %1981  ;;  %v4468_v8 = vld [vmem:[#allocation158_spill] sm:$0xff] }
 0x183   :  { %v445_v39 = vmul.f32 1.442695, %v4467_v13  ;;  %v3206_v52 = vmul.f32 %v3171_v9, %v4468_v8  ;;  %v4471_v13 = vsub.f32 %v4416_v42, %v2966_v31  ;;  %v4472_v60 = vsub.f32 %v4419_v2, %v2966_v31 }
 0x184   :  { %v1805_v12 = vadd.f32 %v3092_v19, %v1804_v56  ;;  %v1308_v51 = vadd.f32 %v1307_v43, %v1245_v46  ;;  %1997 = vpow2.f32 %v441_v21  ;;  %v1819_v56 = vadd.f32 %v3201_v40, %v1818_v41  ;;  %v3219_v19 = vpop.eup %1983 }
 0x185   :  { %v449_v7 = vmul.f32 1.442695, %v4471_v13  ;;  %1999 = vpow2.f32 %v443_v10  ;;  %v451_v63 = vmul.f32 1.442695, %v4472_v60  ;;  %v3225_v43 = vpop.eup %1985  ;;  %v4474_v21 = vsub.f32 %v4422_v15, %v2966_v31 }
 0x186   :  { %v1806_v8 = vadd.f32 %v3101_v17, %v1805_v12  ;;  %v1309_v46 = vadd.f32 %v1308_v51, %v1246_v20  ;;  %4473 = vst [vmem:[#allocation46_spill] sm:$0xff] %v3225_v43  ;;  %2001 = vpow2.f32 %v445_v39  ;;  %v4475_v41 = vsub.f32 %v4423_v37, %v2966_v31  ;;  %v3234_v12 = vpop.eup %1987 }
 0x187   :  { %v453_v42 = vmul.f32 1.442695, %v4474_v21  ;;  %v1820_v59 = vadd.f32 %v3219_v19, %v1819_v56  ;;  %2003 = vpow2.f32 %v447_v1  ;;  %v4476_v2 = vsub.f32 %v4424_v25, %v2966_v31 }
 0x188   :  { %v455_v13 = vmul.f32 1.442695, %v4475_v41  ;;  %v1807_v10 = vadd.f32 %v3108_v33, %v1806_v8  ;;  %v1310_v20 = vadd.f32 %v1309_v46, %v1247_v32  ;;  %v4477_v15 = vsub.f32 %v4427_v6, %v2966_v31  ;;  %v3250_v32 = vpop.eup %1989  ;;  %v4481_v41 = vld [vmem:[#allocation137_spill] sm:$0xff] }
 0x189   :  { %v457_v39 = vmul.f32 1.442695, %v4476_v2  ;;  %v4478_v37 = vsub.f32 %v4428_v55, %v2966_v31  ;;  %v4479_v56 = vsub.f32 %v4431_v61, %v2966_v31  ;;  %v1821_v8 = vadd.f32 %v3234_v12, %v1820_v59  ;;  %v4482_v61 = vld [vmem:[#allocation138_spill] sm:$0xff]  ;;  %v3261_v59 = vpop.eup %1991 }
 0x18a   :  { %v459_v51 = vmul.f32 1.442695, %v4477_v15  ;;  %v1808_v1 = vadd.f32 %v3117_v16, %v1807_v10  ;;  %v1311_v25 = vadd.f32 %v1310_v20, %v1248_v62  ;;  %2005 = vpow2.f32 %v449_v7 }
 0x18b   :  { %v461_v60 = vmul.f32 1.442695, %v4478_v37  ;;  %v463_v21 = vmul.f32 1.442695, %v4479_v56  ;;  %v4480_v6 = vsub.f32 %v4432_v57, %v2966_v31  ;;  %2007 = vpow2.f32 %v451_v63 }
 0x18c   :  { %v1822_v55 = vadd.f32 %v3250_v32, %v1821_v8  ;;  %v1257_v2 = vmul.f32 %v3155_v35, %v4481_v41  ;;  %v1258_v15 = vmul.f32 %v3164_v14, %v4482_v61  ;;  %v1809_v37 = vadd.f32 %v3123_v54, %v1808_v1 }
 0x18d   :  { %v465_v46 = vmul.f32 1.442695, %v4480_v6  ;;  %v1312_v10 = vadd.f32 %v1311_v25, %v1249_v4  ;;  %2009 = vpow2.f32 %v453_v42  ;;  %v4483_v7 = vsub.f32 %v4435_v11, %v2966_v31  ;;  %v3274_v6 = vpop.eup %1993 }
 0x18e   :  { %2011 = vpow2.f32 %v455_v13  ;;  %v4484_v62 = vsub.f32 %v4437_v5, %v2966_v31  ;;  %v4485_v20 = vsub.f32 %v4438_v18, %v2966_v31  ;;  %v1823_v8 = vadd.f32 %v3261_v59, %v1822_v55  ;;  %v3283_v25 = vpop.eup %1995 }
 0x18f   :  { %v467_v57 = vmul.f32 1.442695, %v4483_v7  ;;  %v1810_v4 = vadd.f32 %v3132_v58, %v1809_v37  ;;  %v1313_v42 = vadd.f32 %v1312_v10, %v1250_v29  ;;  %2013 = vpow2.f32 %v457_v39  ;;  %v4542_v58 = vld [vmem:[#allocation17_spill] sm:$0xff] }
 0x190   :  { %v469_v63 = vmul.f32 1.442695, %v4484_v62  ;;  %v471_v56 = vmul.f32 1.442695, %v4485_v20  ;;  %v4486_v11 = vsub.f32 %v4441_v28, %v2966_v31  ;;  %2015 = vpow2.f32 %v459_v51 }
 0x191   :  { %v1824_v5 = vadd.f32 %v3274_v6, %v1823_v8  ;;  %v1259_v1 = vmul.f32 %v3201_v40, %v2787_v22  ;;  %v1322_v18 = vadd.f32 %v1258_v15, %v1257_v2  ;;  %v1811_v55 = vadd.f32 %v3139_v49, %v1810_v4  ;;  %v3293_v22 = vpop.eup %1997  ;;  %v4541_v49 = vld [vmem:[#allocation77_spill] sm:$0xff] }
 0x192   :  { %v473_v13 = vmul.f32 1.442695, %v4486_v11  ;;  %v1314_v41 = vadd.f32 %v1313_v42, %v3177_v30  ;;  %2017 = vpow2.f32 %v461_v60  ;;  %v4487_v29 = vsub.f32 %v4443_v53, %v2966_v31  ;;  %v3300_v53 = vpop.eup %1999 }
 0x193   :  { %2019 = vpow2.f32 %v463_v21  ;;  %v1825_v28 = vadd.f32 %v3283_v25, %v1824_v5  ;;  %v1260_v51 = vmul.f32 %v3219_v19, %v2790_v26  ;;  %v1323_v61 = vadd.f32 %v1322_v18, %v1259_v1  ;;  %4489 = vst [vmem:[#allocation47_spill] sm:$0xff] %v3300_v53  ;;  %v3305_v10 = vpop.eup %2001 }
 0x194   :  { %v475_v39 = vmul.f32 1.442695, %v4487_v29  ;;  %v1812_v2 = vadd.f32 %v3148_v36, %v1811_v55  ;;  %v1315_v15 = vadd.f32 %v1314_v41, %v3187_v3  ;;  %2021 = vpow2.f32 %v465_v46  ;;  %4490 = vst [vmem:[#allocation48_spill] sm:$0xff] %v3305_v10  ;;  %v3312_v62 = vpop.eup %2003  ;;  %v4499_v29 = vld [vmem:[#allocation160_spill] sm:$0xff] }
 0x195   :  { %v4488_v30 = vsub.f32 %v4446_v0, %v2966_v31  ;;  %2023 = vpow2.f32 %v467_v57  ;;  %v1826_v21 = vadd.f32 %v3293_v22, %v1825_v28  ;;  %v1261_v26 = vmul.f32 %v3234_v12, %v2793_v48  ;;  %4492 = vst [vmem:[#allocation49_spill] sm:$0xff] %v3312_v62 }
 0x196   :  { %v1324_v37 = vadd.f32 %v1323_v61, %v1260_v51  ;;  %v1813_v7 = vadd.f32 %v3171_v9, %v1812_v2  ;;  %v1316_v3 = vadd.f32 %v1315_v15, %v3194_v34  ;;  %2025 = vpow2.f32 %v469_v63  ;;  %v4503_v2 = vld [vmem:[#allocation139_spill] sm:$0xff] }
 0x197   :  { %v477_v60 = vmul.f32 1.442695, %v4488_v30  ;;  %v4491_v0 = vsub.f32 %v4450_v44, %v2966_v31  ;;  %2027 = vpow2.f32 %v471_v56  ;;  %v1827_v57 = vadd.f32 %v3300_v53, %v1826_v21  ;;  %v3322_v44 = vpop.eup %2005  ;;  %v4506_v21 = vld [vmem:[#allocation72_spill] sm:$0xff] }
 0x198   :  { %v1262_v48 = vmul.f32 %v3250_v32, %v2796_v23  ;;  %v1325_v20 = vadd.f32 %v1324_v37, %v1261_v26  ;;  %v1814_v8 = vadd.f32 %v3182_v45, %v1813_v7  ;;  %v1317_v4 = vadd.f32 %v1316_v3, %v3206_v52  ;;  %4494 = vst [vmem:[#allocation50_spill] sm:$0xff] %v3322_v44  ;;  %v3327_v23 = vpop.eup %2007 }
 0x199   :  { %v479_v46 = vmul.f32 1.442695, %v4491_v0  ;;  %2029 = vpow2.f32 %v473_v13  ;;  %v4493_v34 = vsub.f32 %v4451_v47, %v2966_v31  ;;  %v1828_v56 = vadd.f32 %v3305_v10, %v1827_v57  ;;  %4495 = vst [vmem:[#allocation51_spill] sm:$0xff] %v3327_v23  ;;  %v4509_v0 = vld [vmem:[#allocation140_spill] sm:$0xff] }
 0x19a   :  { %2031 = vpow2.f32 %v475_v39  ;;  %v1263_v42 = vmul.f32 %v3261_v59, %v2805_v38  ;;  %v1326_v11 = vadd.f32 %v1325_v20, %v1262_v48  ;;  %v1815_v5 = vadd.f32 %v3225_v43, %v1814_v8  ;;  %v3334_v1 = vpop.eup %2009  ;;  %v4500_v39 = vld [vmem:[#allocation68_spill] sm:$0xff]  ;;  %v4511_v20 = vld [vmem:[#allocation141_spill] sm:$0xff] }
 0x19b   :  { %v481_v63 = vmul.f32 1.442695, %v4493_v34  ;;  %v1318_v52 = vadd.f32 %v1317_v4, %v3213_v27  ;;  %2033 = vpow2.f32 %v477_v60  ;;  %v4496_v47 = vsub.f32 %v4453_v24, %v2966_v31  ;;  %4497 = vst [vmem:[#allocation52_spill] sm:$0xff] %v3334_v1  ;;  %v3339_v41 = vpop.eup %2011  ;;  %v4505_v60 = vld [vmem:[#allocation71_spill] sm:$0xff] }
 0x19c   :  { %2035 = vpow2.f32 %v479_v46  ;;  %v1829_v18 = vadd.f32 %v3312_v62, %v1828_v56  ;;  %v1264_v38 = vmul.f32 %v3274_v6, %v2810_v50  ;;  %v1327_v55 = vadd.f32 %v1326_v11, %v1263_v42  ;;  %4498 = vst [vmem:[#allocation53_spill] sm:$0xff] %v3339_v41  ;;  %1816 = vadd.xlane.f32.xlu0 %v1815_v5  ;;  %v3346_v51 = vpop.eup %2013  ;;  %v4513_v56 = vld [vmem:[#allocation73_spill] sm:$0xff]  ;;  %v4515_v5 = vld [vmem:[#allocation74_spill] sm:$0xff] }
 0x19d   :  { %v483_v13 = vmul.f32 1.442695, %v4496_v47  ;;  %v1256_v27 = vmul.f32 %v3225_v43, %v4499_v29  ;;  %2037 = vpow2.f32 %v481_v63  ;;  %v4501_v24 = vsub.f32 %v4500_v39, %v2966_v31  ;;  %4502 = vst [vmem:[#allocation54_spill] sm:$0xff] %v3346_v51  ;;  %v3351_v30 = vpop.eup %2015  ;;  %v4514_v42 = vld [vmem:[#allocation13_spill] sm:$0xff]  ;;  %v4520_v39 = vld [vmem:[#allocation144_spill] sm:$0xff] }
 0x19e   :  { %v1830_v61 = vadd.f32 %v3322_v44, %v1829_v18  ;;  %v1265_v15 = vmul.f32 %v3283_v25, %v4503_v2  ;;  %v1328_v50 = vadd.f32 %v1327_v55, %v1264_v38  ;;  %4504 = vst [vmem:[#allocation55_spill] sm:$0xff] %v3351_v30  ;;  %v4507_v26 = vsub.f32 %v4505_v60, %v4506_v21  ;;  %v4518_v18 = vld [vmem:[#allocation142_spill] sm:$0xff]  ;;  %v4519_v55 = vld [vmem:[#allocation143_spill] sm:$0xff]  ;;  %v4522_v2 = vld [vmem:[#allocation145_spill] sm:$0xff] }
 0x19f   :  { %v485_v28 = vmul.f32 1.442695, %v4501_v24  ;;  %v1319_v7 = vadd.f32 %v1318_v52, %v1256_v27  ;;  %v3356_v3 = vpop.eup %2017  ;;  %2039 = vpow2.f32 %v483_v13  ;;  %v1266_v46 = vmul.f32 %v3293_v22, %v4509_v0  ;;  %v4516_v52 = vld [vmem:[#allocation14_spill] sm:$0xff] }
 0x1a0   :  { %v283_v37 = vmul.f32 1.442695, %v4507_v26  ;;  %4508 = vst [vmem:[#allocation56_spill] sm:$0xff] %v3356_v3  ;;  %v1831_v31 = vadd.f32 %v3327_v23, %v1830_v61  ;;  %v1329_v57 = vadd.f32 %v1328_v50, %v1265_v15  ;;  %v3361_v48 = vpop.eup %2019  ;;  %v1267_v8 = vmul.f32 %v3300_v53, %v4511_v20  ;;  %v4523_v50 = vld [vmem:[#allocation146_spill] sm:$0xff] }
 0x1a1   :  { %4510 = vst [vmem:[#allocation57_spill] sm:$0xff] %v3361_v48  ;;  %1320 = vadd.xlane.f32.xlu0 %v1319_v7  ;;  %2041 = vpow2.f32 %v485_v28  ;;  %v3365_v4 = vpop.eup %2021  ;;  %v1643_v11 = vmul.f32 %v4514_v42, %v4513_v56  ;;  %v1644_v47 = vmul.f32 %v4516_v52, %v4515_v5  ;;  %v1268_v38 = vmul.f32 %v3305_v10, %v4518_v18  ;;  %v4528_v20 = vld [vmem:[#allocation150_spill] sm:$0xff]  ;;  %v4571_v10 = vld [vmem:[#allocation23_spill] sm:$0xff] }
 0x1a2   :  { %4512 = vst [vmem:[#allocation58_spill] sm:$0xff] %v3365_v4  ;;  %v1832_v34 = vadd.f32 %v3334_v1, %v1831_v31  ;;  %v1330_v63 = vadd.f32 %v1329_v57, %v1266_v46  ;;  %v3372_v13 = vpop.eup %2023  ;;  %2043 = vpow2.f32 %v283_v37  ;;  %v1269_v27 = vmul.f32 %v3312_v62, %v4519_v55  ;;  %v4525_v37 = vld [vmem:[#allocation147_spill] sm:$0xff]  ;;  %v4526_v31 = vld [vmem:[#allocation148_spill] sm:$0xff]  ;;  %v4527_v46 = vld [vmem:[#allocation149_spill] sm:$0xff] }
 0x1a3   :  { %4517 = vst [vmem:[#allocation59_spill] sm:$0xff] %v3372_v13  ;;  %v1270_v24 = vmul.f32 %v3322_v44, %v4520_v39  ;;  %v3380_v28 = vpop.eup %2025  ;;  %v1271_v15 = vmul.f32 %v3327_v23, %v4522_v2  ;;  %v1272_v60 = vmul.f32 %v3334_v1, %v4523_v50  ;;  %v1273_v7 = vmul.f32 %v3339_v41, %v4525_v37  ;;  %v4530_v55 = vld [vmem:[#allocation75_spill] sm:$0xff]  ;;  %v4561_v44 = vld [vmem:[#allocation81_spill] sm:$0xff] }
 0x1a4   :  { %4521 = vst [vmem:[#allocation60_spill] sm:$0xff] %v3380_v28  ;;  %v1833_v61 = vadd.f32 %v3339_v41, %v1832_v34  ;;  %v1331_v21 = vadd.f32 %v1330_v63, %v1267_v8  ;;  %v3387_v26 = vpop.eup %2027  ;;  %v1274_v0 = vmul.f32 %v3346_v51, %v4526_v31  ;;  %v3395_v57 = vmul.f32 %v3351_v30, %v4527_v46  ;;  %v4531_v39 = vld [vmem:[#allocation15_spill] sm:$0xff]  ;;  %v4534_v46 = vld [vmem:[#allocation152_spill] sm:$0xff]  ;;  %v4562_v62 = vld [vmem:[#allocation21_spill] sm:$0xff] }
 0x1a5   :  { %4524 = vst [vmem:[#allocation61_spill] sm:$0xff] %v3387_v26  ;;  %v3399_v34 = vmul.f32 %v3356_v3, %v4528_v20  ;;  %v1645_v2 = vmul.f32 %v4531_v39, %v4530_v55  ;;  %v1707_v50 = vadd.f32 %v1644_v47, %v1643_v11  ;;  %v4533_v31 = vld [vmem:[#allocation151_spill] sm:$0xff]  ;;  %v3414_v45 = vmul.f32 %v3365_v4, %v4534_v46  ;;  %v4536_v20 = vld [vmem:[#allocation153_spill] sm:$0xff] }
 0x1a6   :  { %v3401_v18 = vpop.eup %2029  ;;  %v1834_v8 = vadd.f32 %v3346_v51, %v1833_v61  ;;  %v1332_v63 = vadd.f32 %v1331_v21, %v1268_v38  ;;  %v3410_v43 = vmul.f32 %v3361_v48, %v4533_v31  ;;  %v3418_v9 = vmul.f32 %v3372_v13, %v4536_v20  ;;  %v4538_v61 = vld [vmem:[#allocation76_spill] sm:$0xff]  ;;  %v4544_v46 = vld [vmem:[#allocation11_spill] sm:$0xff]  ;;  %v4546_v20 = vld [vmem:[#allocation154_spill] sm:$0xff] }
 0x1a7   :  { %4529 = vst [vmem:[#allocation62_spill] sm:$0xff] %v3401_v18  ;;  %v3406_v37 = vpop.eup %2031  ;;  %4535 = vst [vmem:[#allocation64_spill] sm:$0xff] %v3414_v45  ;;  %v4539_v38 = vld [vmem:[#allocation16_spill] sm:$0xff]  ;;  %v1647_v31 = vmul.f32 %v4542_v58, %v4541_v49  ;;  %v1708_v54 = vadd.f32 %v1707_v50, %v1645_v2  ;;  %v3431_v52 = vmul.f32 %v3380_v28, %v4544_v46  ;;  %v4549_v51 = vld [vmem:[#allocation18_spill] sm:$0xff] }
 0x1a8   :  { %4532 = vst [vmem:[#allocation63_spill] sm:$0xff] %v3406_v37  ;;  %4537 = vst [vmem:[#allocation65_spill] sm:$0xff] %v3418_v9  ;;  %v1646_v21 = vmul.f32 %v4539_v38, %v4538_v61  ;;  %v3422_v36 = vpop.eup %2033  ;;  %v1835_v11 = vadd.f32 %v3351_v30, %v1834_v8  ;;  %v1333_v47 = vadd.f32 %v1332_v63, %v1269_v27  ;;  %v4548_v38 = vld [vmem:[#allocation78_spill] sm:$0xff]  ;;  %v4550_v1 = vld [vmem:[#allocation79_spill] sm:$0xff] }
 0x1a9   :  { %4540 = vst [vmem:[#allocation66_spill] sm:$0xff] %v3422_v36  ;;  %v3427_v39 = vpop.eup %2035  ;;  %4545 = vst [vmem:[#allocation137_spill] sm:$0xff] %v3431_v52  ;;  %v3435_v42 = vmul.f32 %v3387_v26, %v4546_v20  ;;  %v1648_v41 = vmul.f32 %v4549_v51, %v4548_v38  ;;  %v4551_v8 = vld [vmem:[#allocation19_spill] sm:$0xff]  ;;  %v4555_v30 = vld [vmem:[#allocation156_spill] sm:$0xff] }
 0x1aa   :  { %4543 = vst [vmem:[#allocation67_spill] sm:$0xff] %v3427_v39  ;;  %v1649_v27 = vmul.f32 %v4551_v8, %v4550_v1  ;;  %v3441_v63 = vpop.eup %2037  ;;  %v1836_v2 = vadd.f32 %v3356_v3, %v1835_v11  ;;  %v4553_v50 = vld [vmem:[#allocation155_spill] sm:$0xff]  ;;  %v1334_v46 = vadd.f32 %v1333_v47, %v1270_v24  ;;  %v1709_v52 = vadd.f32 %v1708_v54, %v1646_v21  ;;  %v4559_v9 = vld [vmem:[#allocation80_spill] sm:$0xff]  ;;  %v4564_v24 = vld [vmem:[#allocation22_spill] sm:$0xff] }
 0x1ab   :  { %4547 = vst [vmem:[#allocation138_spill] sm:$0xff] %v3435_v42  ;;  %4552 = vst [vmem:[#allocation160_spill] sm:$0xff] %v3441_v63  ;;  %v3446_v58 = vmul.f32 %v3401_v18, %v4553_v50  ;;  %v3450_v20 = vmul.f32 %v3406_v37, %v4555_v30  ;;  %v4557_v42 = vld [vmem:[#allocation12_spill] sm:$0xff]  ;;  %v1651_v11 = vmul.f32 %v4562_v62, %v4561_v44  ;;  %v4566_v30 = vld [vmem:[#allocation157_spill] sm:$0xff] }
 0x1ac   :  { %v3454_v51 = vmul.f32 %v3422_v36, %v4557_v42  ;;  %v4560_v8 = vld [vmem:[#allocation20_spill] sm:$0xff]  ;;  %v1837_v3 = vadd.f32 %v3361_v48, %v1836_v2  ;;  %v1335_v50 = vadd.f32 %v1334_v46, %v1271_v15  ;;  %v1710_v21 = vadd.f32 %v1709_v52, %v1647_v31  ;;  %v3463_v47 = vpop.eup %2039  ;;  %v4568_v42 = vld [vmem:[#allocation158_spill] sm:$0xff]  ;;  %v4575_v48 = vld [vmem:[#allocation85_spill] sm:$0xff] }
 0x1ad   :  { %4554 = vst [vmem:[#allocation68_spill] sm:$0xff] %v3446_v58  ;;  %4556 = vst [vmem:[#allocation139_spill] sm:$0xff] %v3450_v20  ;;  %v1650_v23 = vmul.f32 %v4560_v8, %v4559_v9  ;;  %v4563_v58 = vld [vmem:[#allocation82_spill] sm:$0xff]  ;;  %v3467_v20 = vmul.f32 %v3427_v39, %v4566_v30  ;;  %v4570_v8 = vld [vmem:[#allocation83_spill] sm:$0xff] }
 0x1ae   :  { %4558 = vst [vmem:[#allocation71_spill] sm:$0xff] %v3454_v51  ;;  %v1652_v54 = vmul.f32 %v4564_v24, %v4563_v58  ;;  %4565 = vst [vmem:[#allocation72_spill] sm:$0xff] %v3463_v47  ;;  %v3471_v51 = vmul.f32 %v3441_v63, %v4568_v42  ;;  %v1653_v62 = vmul.f32 %v4571_v10, %v4570_v8  ;;  %v4572_v45 = vld [vmem:[#allocation84_spill] sm:$0xff]  ;;  %v3477_v46 = vpop.eup %2041  ;;  %v4576_v24 = vld [vmem:[#allocation25_spill] sm:$0xff] }
 0x1af   :  { %4567 = vst [vmem:[#allocation140_spill] sm:$0xff] %v3467_v20  ;;  %v4573_v2 = vld [vmem:[#allocation24_spill] sm:$0xff]  ;;  %4574 = vst [vmem:[#allocation73_spill] sm:$0xff] %v3477_v46  ;;  %v1838_v52 = vadd.f32 %v3365_v4, %v1837_v3  ;;  %v1336_v31 = vadd.f32 %v1335_v50, %v1272_v60  ;;  %v1655_v36 = vmul.f32 %v4576_v24, %v4575_v48  ;;  %v4577_v20 = vld [vmem:[#allocation86_spill] sm:$0xff]  ;;  %v3494_v3 = vpop.eup %2043 }
 0x1b0   :  { %4569 = vst [vmem:[#allocation141_spill] sm:$0xff] %v3471_v51  ;;  %v1654_v15 = vmul.f32 %v4573_v2, %v4572_v45  ;;  %v1711_v30 = vadd.f32 %v1710_v21, %v1648_v41  ;;  %v4578_v39 = vld [vmem:[#allocation26_spill] sm:$0xff]  ;;  %v4579_v42 = vld [vmem:[#allocation87_spill] sm:$0xff]  ;;  %v1675_v2 = vmul.f32 %v3155_v35, %v4513_v56  ;;  %v1676_v10 = vmul.f32 %v3164_v14, %v4515_v5  ;;  %v4585_v24 = vld [vmem:[#allocation88_spill] sm:$0xff] }
 0x1b1   :  { %v3484_v53 = vmul.f32 %v4578_v39, %v4577_v20  ;;  %v4580_v51 = vld [vmem:[#allocation27_spill] sm:$0xff]  ;;  %4581 = vst [vmem:[#allocation74_spill] sm:$0xff] %v3494_v3  ;;  %v1839_v60 = vadd.f32 %v3372_v13, %v1838_v52  ;;  %v1337_v21 = vadd.f32 %v1336_v31, %v1273_v7  ;;  %v4586_v4 = vld [vmem:[#allocation28_spill] sm:$0xff]  ;;  %v4588_v35 = vld [vmem:[#allocation89_spill] sm:$0xff] }
 0x1b2   :  { %v3488_v63 = vmul.f32 %v4580_v51, %v4579_v42  ;;  %v4582_v50 = vld [vmem:[#allocation159_spill] sm:$0xff]  ;;  %v1712_v39 = vadd.f32 %v1711_v30, %v1649_v27  ;;  %v3503_v51 = vmul.f32 %v3477_v46, %v4499_v29  ;;  %v3507_v56 = vmul.f32 %v4586_v4, %v4585_v24  ;;  %v4589_v5 = vld [vmem:[#allocation29_spill] sm:$0xff]  ;;  %v4590_v3 = vld [vmem:[#allocation90_spill] sm:$0xff] }
 0x1b3   :  { %v3499_v41 = vmul.f32 %v3463_v47, %v4582_v50  ;;  %v3511_v14 = vmul.f32 %v4589_v5, %v4588_v35  ;;  %v4591_v52 = vld [vmem:[#allocation30_spill] sm:$0xff]  ;;  %v1840_v50 = vadd.f32 %v3380_v28, %v1839_v60  ;;  %v1338_v7 = vadd.f32 %v1337_v21, %v1274_v0  ;;  %v4593_v27 = vld [vmem:[#allocation91_spill] sm:$0xff]  ;;  %v4598_v46 = vld [vmem:[#allocation33_spill] sm:$0xff] }
 0x1b4   :  { %4584 = vst [vmem:[#allocation143_spill] sm:$0xff] %v3503_v51  ;;  %4587 = vst [vmem:[#allocation144_spill] sm:$0xff] %v3507_v56  ;;  %v3515_v13 = vmul.f32 %v4591_v52, %v4590_v3  ;;  %v4594_v31 = vld [vmem:[#allocation31_spill] sm:$0xff]  ;;  %v1713_v29 = vadd.f32 %v1712_v39, %v1650_v23  ;;  %v4595_v51 = vld [vmem:[#allocation92_spill] sm:$0xff]  ;;  %v1677_v52 = vmul.f32 %v3201_v40, %v4530_v55 }
 0x1b5   :  { %4583 = vst [vmem:[#allocation142_spill] sm:$0xff] %v3499_v41  ;;  %v3520_v30 = vmul.f32 %v4594_v31, %v4593_v27  ;;  %v4596_v41 = vld [vmem:[#allocation32_spill] sm:$0xff]  ;;  %v4597_v56 = vld [vmem:[#allocation93_spill] sm:$0xff]  ;;  %v1841_v60 = vadd.f32 %v3387_v26, %v1840_v50  ;;  %v1339_v0 = vadd.f32 %v1338_v7, %v3395_v57  ;;  %v4599_v21 = vld [vmem:[#allocation94_spill] sm:$0xff] }
 0x1b6   :  { %4592 = vst [vmem:[#allocation145_spill] sm:$0xff] %v3515_v13  ;;  %v3524_v4 = vmul.f32 %v4596_v41, %v4595_v51  ;;  %v3528_v5 = vmul.f32 %v4598_v46, %v4597_v56  ;;  %v1740_v13 = vadd.f32 %v1676_v10, %v1675_v2  ;;  %v4600_v31 = vld [vmem:[#allocation34_spill] sm:$0xff]  ;;  %v1714_v23 = vadd.f32 %v1713_v29, %v1651_v11  ;;  %v4602_v39 = vld [vmem:[#allocation95_spill] sm:$0xff]  ;;  %v4604_v51 = vld [vmem:[#allocation96_spill] sm:$0xff] }
 0x1b7   :  { %v3536_v28 = vmul.f32 %v4600_v31, %v4599_v21  ;;  %v3540_v41 = vmul.f32 %v3101_v17, %v4602_v39  ;;  %v3544_v46 = vmul.f32 %v3108_v33, %v4604_v51  ;;  %v1678_v10 = vmul.f32 %v3219_v19, %v4538_v61  ;;  %v4606_v50 = vld [vmem:[#allocation97_spill] sm:$0xff]  ;;  %v4629_v21 = vld [vmem:[#allocation106_spill] sm:$0xff] }
 0x1b8   :  { %v1741_v55 = vadd.f32 %v1740_v13, %v1677_v52  ;;  %v1842_v2 = vadd.f32 %v3401_v18, %v1841_v60  ;;  %v1340_v57 = vadd.f32 %v1339_v0, %v3399_v34  ;;  %v3552_v7 = vmul.f32 %v3117_v16, %v4606_v50  ;;  %v4628_v51 = vld [vmem:[#allocation13_spill] sm:$0xff]  ;;  %v4630_v56 = vld [vmem:[#allocation14_spill] sm:$0xff] }
 0x1b9   :  { %4601 = vst [vmem:[#allocation146_spill] sm:$0xff] %v3536_v28  ;;  %4603 = vst [vmem:[#allocation147_spill] sm:$0xff] %v3540_v41  ;;  %v1715_v11 = vadd.f32 %v1714_v23, %v1652_v54  ;;  %v1679_v29 = vmul.f32 %v3234_v12, %v4541_v49  ;;  %v1680_v33 = vmul.f32 %v3250_v32, %v4548_v38  ;;  %v4608_v38 = vld [vmem:[#allocation47_spill] sm:$0xff] }
 0x1ba   :  { %4605 = vst [vmem:[#allocation148_spill] sm:$0xff] %v3544_v46  ;;  %4607 = vst [vmem:[#allocation149_spill] sm:$0xff] %v3552_v7  ;;  %v1681_v17 = vmul.f32 %v3261_v59, %v4550_v1  ;;  %v1742_v61 = vadd.f32 %v1741_v55, %v1678_v10  ;;  %v1843_v13 = vadd.f32 %v3406_v37, %v1842_v2  ;;  %v4609_v1 = vld [vmem:[#allocation66_spill] sm:$0xff]  ;;  %v4610_v55 = vld [vmem:[#allocation64_spill] sm:$0xff] }
 0x1bb   :  { %v1341_v52 = vadd.f32 %v1340_v57, %v3410_v43  ;;  %v1716_v34 = vadd.f32 %v1715_v11, %v1653_v62  ;;  %v1682_v60 = vmul.f32 %v3274_v6, %v4559_v9  ;;  %v1683_v54 = vmul.f32 %v3283_v25, %v4561_v44  ;;  %v4611_v43 = vld [vmem:[#allocation48_spill] sm:$0xff]  ;;  %v4612_v9 = vld [vmem:[#allocation49_spill] sm:$0xff]  ;;  %v4613_v44 = vld [vmem:[#allocation50_spill] sm:$0xff] }
 0x1bc   :  { %v1684_v49 = vmul.f32 %v3293_v22, %v4563_v58  ;;  %v1685_v0 = vmul.f32 %v4608_v38, %v4570_v8  ;;  %v1743_v23 = vadd.f32 %v1742_v61, %v1679_v29  ;;  %v1844_v10 = vadd.f32 %v4609_v1, %v1843_v13  ;;  %v4614_v58 = vld [vmem:[#allocation51_spill] sm:$0xff]  ;;  %v4616_v13 = vld [vmem:[#allocation65_spill] sm:$0xff]  ;;  %v4643_v37 = vld [vmem:[#allocation20_spill] sm:$0xff] }
 0x1bd   :  { %v1342_v2 = vadd.f32 %v1341_v52, %v4610_v55  ;;  %v1717_v16 = vadd.f32 %v1716_v34, %v1654_v15  ;;  %v1686_v62 = vmul.f32 %v4611_v43, %v4572_v45  ;;  %v1687_v57 = vmul.f32 %v4612_v9, %v4575_v48  ;;  %v4615_v29 = vld [vmem:[#allocation67_spill] sm:$0xff]  ;;  %v4617_v34 = vld [vmem:[#allocation52_spill] sm:$0xff]  ;;  %v4619_v48 = vld [vmem:[#allocation53_spill] sm:$0xff] }
 0x1be   :  { %v3578_v11 = vmul.f32 %v4613_v44, %v4577_v20  ;;  %v3582_v31 = vmul.f32 %v4614_v58, %v4579_v42  ;;  %v1744_v8 = vadd.f32 %v1743_v23, %v1680_v33  ;;  %v1845_v61 = vadd.f32 %v4615_v29, %v1844_v10  ;;  %v4621_v20 = vld [vmem:[#allocation54_spill] sm:$0xff]  ;;  %v4623_v42 = vld [vmem:[#allocation55_spill] sm:$0xff]  ;;  %v4625_v10 = vld [vmem:[#allocation160_spill] sm:$0xff] }
 0x1bf   :  { %v1343_v52 = vadd.f32 %v1342_v2, %v4616_v13  ;;  %v1718_v15 = vadd.f32 %v1717_v16, %v1655_v36  ;;  %v3588_v45 = vmul.f32 %v4617_v34, %v4585_v24  ;;  %v3592_v55 = vmul.f32 %v4619_v48, %v4588_v35  ;;  %v4626_v16 = vld [vmem:[#allocation137_spill] sm:$0xff]  ;;  %v4633_v29 = vld [vmem:[#allocation108_spill] sm:$0xff]  ;;  %v4641_v1 = vld [vmem:[#allocation19_spill] sm:$0xff] }
 0x1c0   :  { %v3596_v50 = vmul.f32 %v4621_v20, %v4590_v3  ;;  %v3600_v33 = vmul.f32 %v4623_v42, %v4593_v27  ;;  %v1745_v23 = vadd.f32 %v1744_v8, %v1681_v17  ;;  %v1846_v2 = vadd.f32 %v4625_v10, %v1845_v61  ;;  %v4627_v13 = vld [vmem:[#allocation105_spill] sm:$0xff]  ;;  %v4631_v3 = vld [vmem:[#allocation107_spill] sm:$0xff]  ;;  %v4634_v27 = vld [vmem:[#allocation16_spill] sm:$0xff] }
 0x1c1   :  { %4618 = vst [vmem:[#allocation150_spill] sm:$0xff] %v3588_v45  ;;  %4620 = vst [vmem:[#allocation75_spill] sm:$0xff] %v3592_v55  ;;  %v1344_v36 = vadd.f32 %v1343_v52, %v4626_v16  ;;  %v1719_v24 = vadd.f32 %v1718_v15, %v3484_v53  ;;  %v807_v39 = vmul.f32 %v4628_v51, %v4627_v13  ;;  %v4635_v8 = vld [vmem:[#allocation138_spill] sm:$0xff]  ;;  %v4636_v53 = vld [vmem:[#allocation109_spill] sm:$0xff] }
 0x1c2   :  { %4622 = vst [vmem:[#allocation151_spill] sm:$0xff] %v3596_v50  ;;  %4624 = vst [vmem:[#allocation152_spill] sm:$0xff] %v3600_v33  ;;  %v1746_v35 = vadd.f32 %v1745_v23, %v1682_v60  ;;  %v808_v7 = vmul.f32 %v4630_v56, %v4629_v21  ;;  %v4632_v50 = vld [vmem:[#allocation15_spill] sm:$0xff]  ;;  %v810_v33 = vmul.f32 %v4634_v27, %v4633_v29  ;;  %v4637_v15 = vld [vmem:[#allocation17_spill] sm:$0xff] }
 0x1c3   :  { %v809_v46 = vmul.f32 %v4632_v50, %v4631_v3  ;;  %v1847_v17 = vadd.f32 %v3463_v47, %v1846_v2  ;;  %v1345_v61 = vadd.f32 %v1344_v36, %v4635_v8  ;;  %v1720_v52 = vadd.f32 %v1719_v24, %v3488_v63  ;;  %v4638_v60 = vld [vmem:[#allocation110_spill] sm:$0xff]  ;;  %v4640_v56 = vld [vmem:[#allocation111_spill] sm:$0xff]  ;;  %v4642_v50 = vld [vmem:[#allocation112_spill] sm:$0xff] }
 0x1c4   :  { %v811_v16 = vmul.f32 %v4637_v15, %v4636_v53  ;;  %v1747_v51 = vadd.f32 %v1746_v35, %v1683_v54  ;;  %v4639_v23 = vld [vmem:[#allocation18_spill] sm:$0xff]  ;;  %v813_v55 = vmul.f32 %v4641_v1, %v4640_v56  ;;  %v814_v18 = vmul.f32 %v4643_v37, %v4642_v50  ;;  %v4644_v27 = vld [vmem:[#allocation73_spill] sm:$0xff]  ;;  %v4645_v2 = vld [vmem:[#allocation68_spill] sm:$0xff] }
 0x1c5   :  { %v812_v10 = vmul.f32 %v4639_v23, %v4638_v60  ;;  %v1848_v26 = vadd.f32 %v4644_v27, %v1847_v17  ;;  %v1346_v47 = vadd.f32 %v1345_v61, %v4645_v2  ;;  %v4646_v36 = vld [vmem:[#allocation144_spill] sm:$0xff]  ;;  %v4647_v63 = vld [vmem:[#allocation113_spill] sm:$0xff]  ;;  %v4649_v54 = vld [vmem:[#allocation114_spill] sm:$0xff]  ;;  %v871_v42 = vadd.f32 %v808_v7, %v807_v39 }
 0x1c6   :  { %v1721_v8 = vadd.f32 %v1720_v52, %v4646_v36  ;;  %v4648_v24 = vld [vmem:[#allocation21_spill] sm:$0xff]  ;;  %v1748_v15 = vadd.f32 %v1747_v51, %v1684_v49  ;;  %v4650_v35 = vld [vmem:[#allocation22_spill] sm:$0xff]  ;;  %v4651_v23 = vld [vmem:[#allocation115_spill] sm:$0xff]  ;;  %v3655_v7 = vmul.f32 %v3234_v12, %v4636_v53  ;;  %v3673_v12 = vmul.f32 %v3283_v25, %v4647_v63 }
 0x1c7   :  { %v815_v41 = vmul.f32 %v4648_v24, %v4647_v63  ;;  %v3631_v45 = vmul.f32 %v4650_v35, %v4649_v54  ;;  %v4652_v28 = vld [vmem:[#allocation23_spill] sm:$0xff]  ;;  %1849 = vadd.xlane.f32.xlu1 %v1848_v26  ;;  %v4654_v52 = vld [vmem:[#allocation42_spill] sm:$0xff]  ;;  %v872_v24 = vadd.f32 %v871_v42, %v809_v46  ;;  %v3645_v35 = vmul.f32 %v3201_v40, %v4631_v3  ;;  %v4657_v39 = vld [vmem:[#allocation145_spill] sm:$0xff] }
 0x1c8   :  { %v3635_v1 = vmul.f32 %v4652_v28, %v4651_v23  ;;  %v4653_v37 = vld [vmem:[#allocation139_spill] sm:$0xff]  ;;  %v1722_v61 = vadd.f32 %v1721_v8, %v3511_v14  ;;  %v839_v2 = vmul.f32 %v4654_v52, %v4627_v13  ;;  %v1749_v51 = vadd.f32 %v1748_v15, %v1685_v0  ;;  %v4660_v53 = vld [vmem:[#allocation141_spill] sm:$0xff]  ;;  %v4674_v52 = vld [vmem:[#allocation56_spill] sm:$0xff] }
 0x1c9   :  { %v1347_v17 = vadd.f32 %v1346_v47, %v4653_v37  ;;  %v4655_v36 = vld [vmem:[#allocation43_spill] sm:$0xff]  ;;  %v3649_v28 = vmul.f32 %v3219_v19, %v4633_v29  ;;  %v873_v0 = vadd.f32 %v872_v24, %v810_v33  ;;  %v3663_v40 = vmul.f32 %v3261_v59, %v4640_v56  ;;  %v4658_v29 = vld [vmem:[#allocation140_spill] sm:$0xff]  ;;  %v4661_v25 = vld [vmem:[#allocation117_spill] sm:$0xff] }
 0x1ca   :  { %v840_v49 = vmul.f32 %v4655_v36, %v4629_v21  ;;  %v4656_v26 = vld [vmem:[#allocation71_spill] sm:$0xff]  ;;  %v1723_v14 = vadd.f32 %v1722_v61, %v4657_v39  ;;  %v3659_v21 = vmul.f32 %v3250_v32, %v4638_v60  ;;  %v1750_v46 = vadd.f32 %v1749_v51, %v1686_v62  ;;  %v4677_v24 = vld [vmem:[#allocation146_spill] sm:$0xff] }
 0x1cb   :  { %v1348_v47 = vadd.f32 %v1347_v17, %v4656_v26  ;;  %v3667_v19 = vmul.f32 %v3274_v6, %v4642_v50  ;;  %v3677_v32 = vmul.f32 %v3293_v22, %v4649_v54  ;;  %v874_v33 = vadd.f32 %v873_v0, %v811_v16  ;;  %v4659_v6 = vld [vmem:[#allocation116_spill] sm:$0xff]  ;;  %v4662_v22 = vld [vmem:[#allocation118_spill] sm:$0xff]  ;;  %v4663_v50 = vld [vmem:[#allocation119_spill] sm:$0xff] }
 0x1cc   :  { %v1724_v13 = vadd.f32 %v1723_v14, %v3520_v30  ;;  %v1751_v62 = vadd.f32 %v1750_v46, %v1687_v57  ;;  %v3681_v59 = vmul.f32 %v4608_v38, %v4651_v23  ;;  %v3685_v3 = vmul.f32 %v4611_v43, %v4659_v6  ;;  %v4664_v43 = vld [vmem:[#allocation120_spill] sm:$0xff]  ;;  %v4666_v54 = vld [vmem:[#allocation121_spill] sm:$0xff]  ;;  %v4670_v37 = vld [vmem:[#allocation123_spill] sm:$0xff] }
 0x1cd   :  { %v1349_v42 = vadd.f32 %v1348_v47, %v4658_v29  ;;  %v3691_v56 = vmul.f32 %v4612_v9, %v4661_v25  ;;  %v3695_v57 = vmul.f32 %v4613_v44, %v4662_v22  ;;  %v875_v38 = vadd.f32 %v874_v33, %v812_v10  ;;  %v4668_v44 = vld [vmem:[#allocation122_spill] sm:$0xff]  ;;  %v4671_v17 = vld [vmem:[#allocation55_spill] sm:$0xff]  ;;  %v4678_v26 = vld [vmem:[#allocation125_spill] sm:$0xff] }
 0x1ce   :  { %v1725_v60 = vadd.f32 %v1724_v13, %v3524_v4  ;;  %v1752_v16 = vadd.f32 %v1751_v62, %v3578_v11  ;;  %v3700_v8 = vmul.f32 %v4614_v58, %v4663_v50  ;;  %v3704_v63 = vmul.f32 %v4617_v34, %v4664_v43  ;;  %v4665_v4 = vld [vmem:[#allocation142_spill] sm:$0xff]  ;;  %v4673_v34 = vld [vmem:[#allocation124_spill] sm:$0xff]  ;;  %v4679_v47 = vld [vmem:[#allocation57_spill] sm:$0xff] }
 0x1cf   :  { %v1350_v30 = vadd.f32 %v1349_v42, %v4660_v53  ;;  %v3710_v23 = vmul.f32 %v4619_v48, %v4666_v54  ;;  %v3714_v11 = vmul.f32 %v4621_v20, %v4668_v44  ;;  %v876_v58 = vadd.f32 %v875_v38, %v813_v55  ;;  %v4681_v20 = vld [vmem:[#allocation126_spill] sm:$0xff]  ;;  %v4685_v29 = vld [vmem:[#allocation127_spill] sm:$0xff]  ;;  %v4688_v62 = vld [vmem:[#allocation128_spill] sm:$0xff] }
 0x1d0   :  { %v1726_v9 = vadd.f32 %v1725_v60, %v3528_v5  ;;  %v1753_v10 = vadd.f32 %v1752_v16, %v3582_v31  ;;  %v3719_v61 = vmul.f32 %v4671_v17, %v4670_v37  ;;  %v3723_v36 = vmul.f32 %v4674_v52, %v4673_v34  ;;  %v4676_v5 = vld [vmem:[#allocation143_spill] sm:$0xff]  ;;  %v4682_v14 = vld [vmem:[#allocation58_spill] sm:$0xff]  ;;  %v4689_v33 = vld [vmem:[#allocation60_spill] sm:$0xff] }
 0x1d1   :  { %v1351_v15 = vadd.f32 %v1350_v30, %v4665_v4  ;;  %4667 = vst [vmem:[#allocation153_spill] sm:$0xff] %v3710_v23  ;;  %4669 = vst [vmem:[#allocation76_spill] sm:$0xff] %v3714_v11  ;;  %v3729_v39 = vmul.f32 %v4679_v47, %v4678_v26  ;;  %v3733_v31 = vmul.f32 %v4682_v14, %v4681_v20  ;;  %v4684_v55 = vld [vmem:[#allocation150_spill] sm:$0xff]  ;;  %v4686_v42 = vld [vmem:[#allocation59_spill] sm:$0xff] }
 0x1d2   :  { %4672 = vst [vmem:[#allocation77_spill] sm:$0xff] %v3719_v61  ;;  %4675 = vst [vmem:[#allocation11_spill] sm:$0xff] %v3723_v36  ;;  %v1727_v48 = vadd.f32 %v1726_v9, %v4677_v24  ;;  %v1754_v46 = vadd.f32 %v1753_v10, %v4684_v55  ;;  %v877_v0 = vadd.f32 %v876_v58, %v814_v18  ;;  %v4691_v30 = vld [vmem:[#allocation147_spill] sm:$0xff]  ;;  %v4692_v16 = vld [vmem:[#allocation129_spill] sm:$0xff] }
 0x1d3   :  { %v1352_v51 = vadd.f32 %v1351_v15, %v4676_v5  ;;  %4680 = vst [vmem:[#allocation154_spill] sm:$0xff] %v3729_v39  ;;  %4683 = vst [vmem:[#allocation78_spill] sm:$0xff] %v3733_v31  ;;  %v3738_v13 = vmul.f32 %v4686_v42, %v4685_v29  ;;  %v3742_v53 = vmul.f32 %v4689_v33, %v4688_v62  ;;  %v4693_v38 = vld [vmem:[#allocation61_spill] sm:$0xff]  ;;  %v4695_v15 = vld [vmem:[#allocation130_spill] sm:$0xff] }
 0x1d4   :  { %v1728_v60 = vadd.f32 %v1727_v48, %v4691_v30  ;;  %v3747_v4 = vmul.f32 %v4693_v38, %v4692_v16  ;;  %v4696_v9 = vld [vmem:[#allocation62_spill] sm:$0xff]  ;;  %v4698_v18 = vld [vmem:[#allocation131_spill] sm:$0xff]  ;;  %v878_v55 = vadd.f32 %v877_v0, %v815_v41  ;;  %v4705_v48 = vld [vmem:[#allocation133_spill] sm:$0xff] }
 0x1d5   :  { %4687 = vst [vmem:[#allocation79_spill] sm:$0xff] %v3738_v13  ;;  %4690 = vst [vmem:[#allocation155_spill] sm:$0xff] %v3742_v53  ;;  %1353 = vadd.xlane.f32.xlu0 %v1352_v51  ;;  %v3751_v17 = vmul.f32 %v4696_v9, %v4695_v15  ;;  %v4699_v10 = vld [vmem:[#allocation63_spill] sm:$0xff]  ;;  %v4702_v13 = vld [vmem:[#allocation132_spill] sm:$0xff] }
 0x1d6   :  { %4694 = vst [vmem:[#allocation156_spill] sm:$0xff] %v3747_v4  ;;  %v3755_v58 = vmul.f32 %v4699_v10, %v4698_v18  ;;  %v4701_v5 = vld [vmem:[#allocation75_spill] sm:$0xff]  ;;  %v4703_v53 = vld [vmem:[#allocation66_spill] sm:$0xff]  ;;  %v4708_v4 = vld [vmem:[#allocation148_spill] sm:$0xff] }
 0x1d7   :  { %4697 = vst [vmem:[#allocation12_spill] sm:$0xff] %v3751_v17  ;;  %v1755_v24 = vadd.f32 %v1754_v46, %v4701_v5  ;;  %v3760_v51 = vmul.f32 %v4703_v53, %v4702_v13  ;;  %v4706_v30 = vld [vmem:[#allocation67_spill] sm:$0xff]  ;;  %v1729_v39 = vadd.f32 %v1728_v60, %v4708_v4  ;;  %v4709_v36 = vld [vmem:[#allocation134_spill] sm:$0xff]  ;;  %v4710_v61 = vld [vmem:[#allocation160_spill] sm:$0xff] }
 0x1d8   :  { %4700 = vst [vmem:[#allocation80_spill] sm:$0xff] %v3755_v58  ;;  %v3764_v31 = vmul.f32 %v4706_v30, %v4705_v48  ;;  %v3769_v17 = vmul.f32 %v4710_v61, %v4709_v36  ;;  %v4712_v11 = vld [vmem:[#allocation135_spill] sm:$0xff]  ;;  %v4713_v18 = vld [vmem:[#allocation72_spill] sm:$0xff]  ;;  %v904_v48 = vadd.f32 %v840_v49, %v839_v2  ;;  %v4720_v13 = vld [vmem:[#allocation149_spill] sm:$0xff] }
 0x1d9   :  { %4704 = vst [vmem:[#allocation81_spill] sm:$0xff] %v3760_v51  ;;  %v3773_v58 = vmul.f32 %v4713_v18, %v4712_v11  ;;  %v4715_v46 = vld [vmem:[#allocation136_spill] sm:$0xff]  ;;  %v4717_v0 = vld [vmem:[#allocation151_spill] sm:$0xff]  ;;  %v879_v51 = vadd.f32 %v878_v55, %v3631_v45  ;;  %v1730_v36 = vadd.f32 %v1729_v39, %v4720_v13  ;;  %v4722_v11 = vmov 0.0   ;;  %v4725_v55 = vld [vmem:[#allocation74_spill] sm:$0xff] }
 0x1da   :  { %4707 = vst [vmem:[#allocation82_spill] sm:$0xff] %v3764_v31  ;;  %4711 = vst [vmem:[#allocation157_spill] sm:$0xff] %v3769_v17  ;;  %v3777_v41 = vmul.f32 %v4644_v27, %v4715_v46  ;;  %v1756_v5 = vadd.f32 %v1755_v24, %v4717_v0  ;;  %v4718_v31 = vld [vmem:[#allocation98_spill] sm:$0xff]  ;;  %v4719_v60 = vld [vmem:[#allocation36_spill] sm:$0xff]  ;;  %1865 = vperm.xlu1 %1913, %v4725_v55   ;;  %v905_v39 = vadd.f32 %v904_v48, %v3645_v35 }
 0x1db   :  { %4714 = vst [vmem:[#allocation158_spill] sm:$0xff] %v3773_v58  ;;  %v1668_v4 = vmul.f32 %v4719_v60, %v4718_v31  ;;  %v4721_v17 = vld [vmem:[#allocation92_spill] sm:$0xff]  ;;  %48 = vst.msk [vmem:[#allocation4 + $0x8] sm:$0xff] %vm46_vm1, %v4722_v11  ;;  %v880_v49 = vadd.f32 %v879_v51, %v3635_v1  ;;  %v4726_v13 = vld [vmem:[#allocation99_spill] sm:$0xff] }
 0x1dc   :  { %4716 = vst [vmem:[#allocation83_spill] sm:$0xff] %v3777_v41  ;;  %v1694_v23 = vmul.f32 %v4674_v52, %v4721_v17  ;;  %47 = vst.msk [vmem:[#allocation4] sm:$0xff] %vm46_vm1, %v4722_v11  ;;  %v4723_v41 = vld [vmem:[#allocation152_spill] sm:$0xff]  ;;  %v4727_v0 = vld [vmem:[#allocation37_spill] sm:$0xff] }
 0x1dd   :  { %v1757_v24 = vadd.f32 %v1756_v5, %v4723_v41  ;;  %v4724_v45 = vld [vmem:[#allocation24_spill] sm:$0xff]  ;;  %v1669_v52 = vmul.f32 %v4727_v0, %v4726_v13  ;;  %v1731_v17 = vadd.f32 %v1730_v36, %v1668_v4  ;;  %v4728_v58 = vld [vmem:[#allocation93_spill] sm:$0xff]  ;;  %v4731_v1 = vld [vmem:[#allocation38_spill] sm:$0xff] }
 0x1de   :  { %v818_v2 = vmul.f32 %v4724_v45, %v4659_v6  ;;  %v1695_v46 = vmul.f32 %v4679_v47, %v4728_v58  ;;  %v4729_v11 = vld [vmem:[#allocation25_spill] sm:$0xff]  ;;  %v906_v6 = vadd.f32 %v905_v39, %v3649_v28  ;;  %v4730_v45 = vld [vmem:[#allocation100_spill] sm:$0xff]  ;;  %v4732_v15 = vld [vmem:[#allocation94_spill] sm:$0xff] }
 0x1df   :  { %v1758_v60 = vadd.f32 %v1757_v24, %v1694_v23  ;;  %v819_v41 = vmul.f32 %v4729_v11, %v4661_v25  ;;  %v1670_v51 = vmul.f32 %v4731_v1, %v4730_v45  ;;  %v1732_v55 = vadd.f32 %v1731_v17, %v1669_v52  ;;  %v4733_v36 = vld [vmem:[#allocation26_spill] sm:$0xff]  ;;  %v4734_v47 = vld [vmem:[#allocation101_spill] sm:$0xff]  ;;  %v4737_v39 = vld [vmem:[#allocation27_spill] sm:$0xff] }
 0x1e0   :  { %v881_v5 = vadd.f32 %v880_v49, %v818_v2  ;;  %v1696_v35 = vmul.f32 %v4682_v14, %v4732_v15  ;;  %v820_v4 = vmul.f32 %v4733_v36, %v4662_v22  ;;  %v907_v23 = vadd.f32 %v906_v6, %v3655_v7  ;;  %v4735_v58 = vld [vmem:[#allocation41_spill] sm:$0xff]  ;;  %v4736_v2 = vld [vmem:[#allocation95_spill] sm:$0xff]  ;;  %v4738_v15 = vld [vmem:[#allocation102_spill] sm:$0xff] }
 0x1e1   :  { %v1759_v48 = vadd.f32 %v1758_v60, %v1695_v46  ;;  %v1671_v25 = vmul.f32 %v4735_v58, %v4734_v47  ;;  %v1733_v24 = vadd.f32 %v1732_v55, %v1670_v51  ;;  %v1697_v28 = vmul.f32 %v4686_v42, %v4736_v2  ;;  %v4739_v46 = vld [vmem:[#allocation44_spill] sm:$0xff]  ;;  %v4742_v51 = vld [vmem:[#allocation103_spill] sm:$0xff]  ;;  %v4747_v2 = vld [vmem:[#allocation46_spill] sm:$0xff] }
 0x1e2   :  { %v882_v0 = vadd.f32 %v881_v5, %v819_v41  ;;  %v821_v52 = vmul.f32 %v4737_v39, %v4663_v50  ;;  %v908_v14 = vadd.f32 %v907_v23, %v3659_v21  ;;  %v1672_v22 = vmul.f32 %v4739_v46, %v4738_v15  ;;  %v4740_v11 = vld [vmem:[#allocation96_spill] sm:$0xff]  ;;  %v4748_v39 = vld [vmem:[#allocation30_spill] sm:$0xff] }
 0x1e3   :  { %v1760_v49 = vadd.f32 %v1759_v48, %v1696_v35  ;;  %v1734_v60 = vadd.f32 %v1733_v24, %v1671_v25  ;;  %v1698_v7 = vmul.f32 %v4689_v33, %v4740_v11  ;;  %v4741_v55 = vld [vmem:[#allocation28_spill] sm:$0xff]  ;;  %v4743_v35 = vld [vmem:[#allocation45_spill] sm:$0xff] }
 0x1e4   :  { %v883_v17 = vadd.f32 %v882_v0, %v820_v4  ;;  %v822_v5 = vmul.f32 %v4741_v55, %v4664_v43  ;;  %v909_v42 = vadd.f32 %v908_v14, %v3663_v40  ;;  %v1673_v50 = vmul.f32 %v4743_v35, %v4742_v51  ;;  %v4744_v48 = vld [vmem:[#allocation97_spill] sm:$0xff]  ;;  %v4746_v24 = vld [vmem:[#allocation104_spill] sm:$0xff] }
 0x1e5   :  { %v1761_v41 = vadd.f32 %v1760_v49, %v1697_v28  ;;  %v1735_v0 = vadd.f32 %v1734_v60, %v1672_v22  ;;  %v1699_v21 = vmul.f32 %v4693_v38, %v4744_v48  ;;  %v4745_v4 = vld [vmem:[#allocation29_spill] sm:$0xff]  ;;  %v1674_v43 = vmul.f32 %v4747_v2, %v4746_v24 }
 0x1e6   :  { %v884_v6 = vadd.f32 %v883_v17, %v821_v52  ;;  %v823_v23 = vmul.f32 %v4745_v4, %v4666_v54  ;;  %v910_v33 = vadd.f32 %v909_v42, %v3667_v19  ;;  %v1700_v40 = vmul.f32 %v4696_v9, %v4718_v31  ;;  %v4749_v19 = vld [vmem:[#allocation31_spill] sm:$0xff]  ;;  %v4752_v42 = vld [vmem:[#allocation34_spill] sm:$0xff] }
 0x1e7   :  { %v1762_v36 = vadd.f32 %v1761_v41, %v1698_v7  ;;  %v1736_v28 = vadd.f32 %v1735_v0, %v1673_v50  ;;  %v824_v52 = vmul.f32 %v4748_v39, %v4668_v44  ;;  %v1701_v54 = vmul.f32 %v4699_v10, %v4726_v13  ;;  %v4750_v44 = vld [vmem:[#allocation32_spill] sm:$0xff]  ;;  %v4753_v0 = vld [vmem:[#allocation39_spill] sm:$0xff] }
 0x1e8   :  { %v885_v25 = vadd.f32 %v884_v6, %v822_v5  ;;  %v911_v38 = vadd.f32 %v910_v33, %v3673_v12  ;;  %v825_v60 = vmul.f32 %v4749_v19, %v4670_v37  ;;  %v1702_v31 = vmul.f32 %v4703_v53, %v4730_v45  ;;  %v4751_v37 = vld [vmem:[#allocation33_spill] sm:$0xff]  ;;  %v4761_v39 = vld [vmem:[#allocation76_spill] sm:$0xff]  ;;  %v4765_v19 = vld [vmem:[#allocation11_spill] sm:$0xff] }
 0x1e9   :  { %v1763_v49 = vadd.f32 %v1762_v36, %v1699_v21  ;;  %v1737_v14 = vadd.f32 %v1736_v28, %v1674_v43  ;;  %v826_v41 = vmul.f32 %v4750_v44, %v4673_v34  ;;  %v1703_v10 = vmul.f32 %v4706_v30, %v4734_v47  ;;  %v4754_v21 = vld [vmem:[#allocation40_spill] sm:$0xff]  ;;  %v4759_v28 = vld [vmem:[#allocation131_spill] sm:$0xff] }
 0x1ea   :  { %v886_v17 = vadd.f32 %v885_v25, %v823_v23  ;;  %v912_v7 = vadd.f32 %v911_v38, %v3677_v32  ;;  %v827_v5 = vmul.f32 %v4751_v37, %v4678_v26  ;;  %v1704_v53 = vmul.f32 %v4710_v61, %v4738_v15  ;;  %v4756_v25 = vld [vmem:[#allocation130_spill] sm:$0xff]  ;;  %v4763_v38 = vld [vmem:[#allocation77_spill] sm:$0xff] }
 0x1eb   :  { %v1764_v22 = vadd.f32 %v1763_v49, %v1700_v40  ;;  %1738 = vadd.xlane.f32.xlu0 %v1737_v14  ;;  %v828_v34 = vmul.f32 %v4752_v42, %v4681_v20  ;;  %v1705_v30 = vmul.f32 %v4713_v18, %v4742_v51  ;;  %v829_v26 = vmul.f32 %v4753_v0, %v4685_v29  ;;  %v4755_v18 = vld [vmem:[#allocation35_spill] sm:$0xff]  ;;  %v4760_v40 = vld [vmem:[#allocation37_spill] sm:$0xff]  ;;  %v4777_v0 = vld [vmem:[#allocation82_spill] sm:$0xff] }
 0x1ec   :  { %v887_v11 = vadd.f32 %v886_v17, %v824_v52  ;;  %v913_v55 = vadd.f32 %v912_v7, %v3681_v59  ;;  %v1706_v61 = vmul.f32 %v4644_v27, %v4746_v24  ;;  %v830_v20 = vmul.f32 %v4754_v21, %v4688_v62  ;;  %v4758_v27 = vld [vmem:[#allocation153_spill] sm:$0xff]  ;;  %v4762_v52 = vld [vmem:[#allocation132_spill] sm:$0xff] }
 0x1ed   :  { %v1765_v9 = vadd.f32 %v1764_v22, %v1701_v54  ;;  %v831_v51 = vmul.f32 %v4755_v18, %v4692_v16  ;;  %v833_v62 = vmul.f32 %v4760_v40, %v4759_v28  ;;  %v834_v17 = vmul.f32 %v4731_v1, %v4762_v52  ;;  %v4769_v1 = vld [vmem:[#allocation78_spill] sm:$0xff] }
 0x1ee   :  { %v888_v12 = vadd.f32 %v887_v11, %v825_v60  ;;  %v914_v32 = vadd.f32 %v913_v55, %v3685_v3  ;;  %v4766_v11 = vld [vmem:[#allocation134_spill] sm:$0xff] }
 0x1ef   :  { %v1766_v13 = vadd.f32 %v1765_v9, %v1702_v31  ;;  %v836_v7 = vmul.f32 %v4739_v46, %v4766_v11  ;;  %v4767_v9 = vld [vmem:[#allocation154_spill] sm:$0xff]  ;;  %v4773_v46 = vld [vmem:[#allocation156_spill] sm:$0xff] }
 0x1f0   :  { %v889_v6 = vadd.f32 %v888_v12, %v826_v41  ;;  %v915_v59 = vadd.f32 %v914_v32, %v3691_v56  ;;  %v4768_v41 = vld [vmem:[#allocation135_spill] sm:$0xff] }
 0x1f1   :  { %v1767_v45 = vadd.f32 %v1766_v13, %v1703_v10  ;;  %v837_v12 = vmul.f32 %v4743_v35, %v4768_v41  ;;  %v4770_v13 = vld [vmem:[#allocation136_spill] sm:$0xff]  ;;  %v4776_v35 = vld [vmem:[#allocation81_spill] sm:$0xff] }
 0x1f2   :  { %v890_v50 = vadd.f32 %v889_v6, %v827_v5  ;;  %v916_v3 = vadd.f32 %v915_v59, %v3695_v57  ;;  %v4757_v57 = vld [vmem:[#allocation36_spill] sm:$0xff]  ;;  %v838_v37 = vmul.f32 %v4747_v2, %v4770_v13  ;;  %v4779_v2 = vld [vmem:[#allocation158_spill] sm:$0xff] }
 0x1f3   :  { %v1768_v47 = vadd.f32 %v1767_v45, %v1704_v53  ;;  %v832_v33 = vmul.f32 %v4757_v57, %v4756_v25  ;;  %v4772_v53 = vld [vmem:[#allocation155_spill] sm:$0xff]  ;;  %v4775_v59 = vld [vmem:[#allocation80_spill] sm:$0xff] }
 0x1f4   :  { %v891_v48 = vadd.f32 %v890_v50, %v828_v34  ;;  %v917_v56 = vadd.f32 %v916_v3, %v3700_v8  ;;  %v4774_v34 = vld [vmem:[#allocation12_spill] sm:$0xff] }
 0x1f5   :  { %v1769_v15 = vadd.f32 %v1768_v47, %v1705_v30 }
 0x1f6   :  { %v892_v36 = vadd.f32 %v891_v48, %v829_v26  ;;  %v918_v29 = vadd.f32 %v917_v56, %v3704_v63  ;;  %v4764_v63 = vld [vmem:[#allocation133_spill] sm:$0xff] }
 0x1f7   :  { %v1770_v4 = vadd.f32 %v1769_v15, %v1706_v61  ;;  %v835_v54 = vmul.f32 %v4735_v58, %v4764_v63  ;;  %v4771_v58 = vld [vmem:[#allocation79_spill] sm:$0xff]  ;;  %v4778_v48 = vld [vmem:[#allocation157_spill] sm:$0xff]  ;;  %v1857_v63 = vld [vmem:[#allocation4 + $0x8] sm:$0xff] }
 0x1f8   :  { %v893_v23 = vadd.f32 %v892_v36, %v830_v20  ;;  %v919_v24 = vadd.f32 %v918_v29, %v4758_v27  ;;  %v4780_v15 = vld [vmem:[#allocation83_spill] sm:$0xff]  ;;  %v4781_v20 = vld [vmem:[#allocation69_spill] sm:$0xff]  ;;  %v4782_v36 = vld [vmem:[#allocation70_spill] sm:$0xff] }
 0x1f9   :  { %1771 = vadd.xlane.f32.xlu0 %v1770_v4  ;;  %v4783_v56 = vsub.f32 %v4781_v20, %v4782_v36  ;;  %v4784_v27 = vld [vmem:[#allocation74_spill] sm:$0xff] }
 0x1fa   :  { %v894_v43 = vadd.f32 %v893_v23, %v831_v51  ;;  %v920_v8 = vadd.f32 %v919_v24, %v4761_v39  ;;  %v1781_v51 = vld [vmem:[#allocation3] sm:$0xff] }
 0x1fb   :  { %v281_v4 = vmul.f32 1.442695, %v4783_v56 }
 0x1fc   :  { %v895_v49 = vadd.f32 %v894_v43, %v832_v33  ;;  %v921_v14 = vadd.f32 %v920_v8, %v4763_v38  ;;  %v1782_v43 = vld [vmem:[#allocation3 + $0x8] sm:$0xff]  ;;  %v4785_v38 = vlaneseq }
 0x1fd   :  { %2045 = vpow2.f32 %v281_v4  ;;  %v1784_v24 = vmul.f32 %v4784_v27, %v1782_v43 }
 0x1fe   :  { %v896_v16 = vadd.f32 %v895_v49, %v833_v62  ;;  %v922_v60 = vadd.f32 %v921_v14, %v4765_v19  ;;  %v1774_v14 = vand.u32 127, %v4785_v38 }
 0x200   :  { %v897_v22 = vadd.f32 %v896_v16, %v834_v17  ;;  %v923_v44 = vadd.f32 %v922_v60, %v4767_v9  ;;  %vm1776_vm2 = vcmp.eq.s32.totalorder %v1774_v14, 1  ;;  %vm1775_vm3 = vcmp.eq.s32.totalorder %v1774_v14, 0 }
 0x202   :  { %v898_v31 = vadd.f32 %v897_v22, %v835_v54  ;;  %v924_v10 = vadd.f32 %v923_v44, %v4769_v1 }
 0x204   :  { %v899_v55 = vadd.f32 %v898_v31, %v836_v7  ;;  %v925_v6 = vadd.f32 %v924_v10, %v4771_v58  ;;  %v1856_v31 = vld [vmem:[#allocation4] sm:$0xff] }
 0x206   :  { %v900_v5 = vadd.f32 %v899_v55, %v837_v12  ;;  %v926_v45 = vadd.f32 %v925_v6, %v4772_v53 }
 0x208   :  { %v901_v32 = vadd.f32 %v900_v5, %v838_v37  ;;  %v927_v42 = vadd.f32 %v926_v45, %v4773_v46 }
 0x20a   :  { %902 = vadd.xlane.f32.xlu0 %v901_v32  ;;  %v928_v50 = vadd.f32 %v927_v42, %v4774_v34  ;;  %v2046_v18 = vpop.eup %2045 }
 0x20b   :  { %v1783_v23 = vmul.f32 %v2046_v18, %v1781_v51 }
 0x20c   :  { %v929_v30 = vadd.f32 %v928_v50, %v4775_v59 }
 0x20e   :  { %v930_v47 = vadd.f32 %v929_v30, %v4776_v35 }
 0x210   :  { %v931_v26 = vadd.f32 %v930_v47, %v4777_v0 }
 0x212   :  { %v932_v3 = vadd.f32 %v931_v26, %v4778_v48 }
 0x214   :  { %v933_v61 = vadd.f32 %v932_v3, %v4779_v2 }
 0x216   :  { %v934_v21 = vadd.f32 %v933_v61, %v4780_v15 }
 0x218   :  { %935 = vadd.xlane.f32.xlu0 %v934_v21 }
 0x225   :  { %v1817_v29 = vpop.xlane.xlu0 %1816 }
 0x226   :  { %v1851_v25 = vadd.f32 %v1817_v29, %v1783_v23 }
 0x228   :  { %1854 = vst.msk [vmem:[#allocation3] sm:$0xff] %vm41_vm0, %v1851_v25 }
 0x22a   :  { %v1321_v39 = vpop.xlane.xlu0 %1320 }
 0x22e   :  { %1860 = vperm.xlu0 %1914, %v2046_v18  }
 0x22f   :  { %v1882_v57 = vld [vmem:[#allocation3] sm:$0xff] }
 0x230   :  { %2047 = vrcp.f32 %v1882_v57 }
 0x23d   :  { %v2048_v33 = vpop.eup %2047 }
 0x23e   :  { %1888 = vperm.xlu1 %1913, %v2048_v33  }
 0x250   :  { %v1850_v28 = vpop.xlane.xlu1 %1849 }
 0x251   :  { %v1852_v40 = vadd.f32 %v1850_v28, %v1784_v24 }
 0x253   :  { %1855 = vst.msk [vmem:[#allocation3 + $0x8] sm:$0xff] %vm41_vm0, %v1852_v40 }
 0x255   :  { %v1866_v54 = vpop.permute.xlu1 %1865 }
 0x256   :  { %v1869_v22 = vmul.f32 %v1866_v54, %v1857_v63 }
 0x25a   :  { %v1883_v62 = vld [vmem:[#allocation3 + $0x8] sm:$0xff] }
 0x25b   :  { %2049 = vrcp.f32 %v1883_v62 }
 0x25e   :  { %v1354_v8 = vpop.xlane.xlu0 %1353 }
 0x268   :  { %v2050_v49 = vpop.eup %2049 }
 0x269   :  { %1893 = vperm.xlu1 %1913, %v2050_v49  }
 0x274   :  { %v1739_v52 = vpop.xlane.xlu0 %1738 }
 0x275   :  { %v1777_v44 = vsel %vm1776_vm2, %v1321_v39, %v1739_v52 }
 0x282   :  { %v1772_v17 = vpop.xlane.xlu0 %1771 }
 0x283   :  { %v1778_v19 = vsel %vm1776_vm2, %v1354_v8, %v1772_v17 }
 0x293   :  { %v903_v16 = vpop.xlane.xlu0 %902 }
 0x294   :  { %v1779_v12 = vsel %vm1775_vm3, %v903_v16, %v1777_v44 }
 0x2a1   :  { %v936_v60 = vpop.xlane.xlu0 %935 }
 0x2a2   :  { %v1780_v11 = vsel %vm1775_vm3, %v936_v60, %v1778_v19 }
 0x2a3   :  { %v1871_v7 = vadd.f32 %v1869_v22, %v1780_v11 }
 0x2a5   :  { %1874 = vst.msk [vmem:[#allocation4 + $0x8] sm:$0xff] %vm46_vm1, %v1871_v7 }
 0x2a9   :  { %v1861_v9 = vpop.permute.xlu0 %1860 }
 0x2aa   :  { %v1868_v41 = vmul.f32 %v1861_v9, %v1856_v31 }
 0x2ac   :  { %v1870_v55 = vadd.f32 %v1868_v41, %v1779_v12  ;;  %v1881_v37 = vld [vmem:[#allocation4 + $0x8] sm:$0xff] }
 0x2ae   :  { %1873 = vst.msk [vmem:[#allocation4] sm:$0xff] %vm46_vm1, %v1870_v55 }
 0x2b5   :  { %v1880_v1 = vld [vmem:[#allocation4] sm:$0xff] }
 0x2b9   :  { %v1889_v10 = vpop.permute.xlu1 %1888 }
 0x2ba   :  { %v1896_v13 = vmul.f32 %v1889_v10, %v1880_v1 }
 0x2bc   :  { %1898 = vst.msk [vmem:[%s3920_s2] sm:$0xff] %vm46_vm1, %v1896_v13 }
 0x2e4   :  { %v1894_v5 = vpop.permute.xlu1 %1893 }
 0x2e5   :  { %v1897_v58 = vmul.f32 %v1894_v5, %v1881_v37 }
 0x2e7   :  { %1899 = vst.msk [vmem:[%s3920_s2 + $0x8] sm:$0xff] %vm46_vm1, %v1897_v58 }
 0x2e8   :  { %1904 = vsyncpa [#allocation6], 1 }
 0x2e9   :  { %1905 = vsyncpa [#allocation8], 1 }

</bundles_post_ra>
